<compile_context>
chip_gen: v7x
topology: tpu7x:2x2x1
jax: 0.10.0
libtpu: 0.0.40
codegen_flags: <defaults>
</compile_context>

<pallas_src>
import functools

import jax
import jax.numpy as jnp
from jax.experimental import pallas as pl
from jax.experimental.pallas import tpu as pltpu

NEG_SLOPE = 0.01                   # nn.LeakyReLU default negative_slope
_LANE = 128                        # lane-axis alignment
_VMEM_LIMIT = 32 * 1024 * 1024     # explicit scoped-VMEM limit (safe on v5e/v6e/v7x)
# Tile targets: 128 works on every generation (v5e MXU is 128x128). On v6e
# (128 MiB VMEM) tm/tk can be raised to 512+; on v7x keep tiles modest and
# rely on the "parallel" grid axes for the 2 TensorCores.
_TM, _TN, _TK = 128, 128, 128


def _leaky_relu(x):
    return jnp.where(x > 0, x, NEG_SLOPE * x)


def _round_up(n, m):
    return ((n + m - 1) // m) * m


def _pad2d(x, rows, cols):
    r, c = x.shape
    return jnp.pad(x, ((0, rows - r), (0, cols - c)))


def _tile(dim, target):
    """Largest multiple-of-128 tile <= target that divides dim (dims padded to 128)."""
    if dim <= target:
        return dim
    t = (target // _LANE) * _LANE
    while dim % t:
        t -= _LANE
    return t


# --------------------------------------------------------------------------
# Kernels
# --------------------------------------------------------------------------
def _matmul_kernel(x_ref, w_ref, o_ref, acc_ref, *, act):
    """o = [leaky_relu](x @ w), K-tiled with an f32 VMEM accumulator."""
    @pl.when(pl.program_id(2) == 0)
    def _init():
        acc_ref[...] = jnp.zeros_like(acc_ref)

    acc_ref[...] += jnp.dot(x_ref[...], w_ref[...],
                            preferred_element_type=jnp.float32)

    @pl.when(pl.program_id(2) == pl.num_programs(2) - 1)
    def _finalize():
        r = acc_ref[...]
        if act:
            r = _leaky_relu(r)
        o_ref[...] = r.astype(o_ref.dtype)


def _matmul_act_scale_kernel(x_ref, w_ref, att_ref, o_ref, os_ref, acc_ref):
    """o = leaky_relu(x @ w);  os = att * o  (att is a per-row scale, fused)."""
    @pl.when(pl.program_id(2) == 0)
    def _init():
        acc_ref[...] = jnp.zeros_like(acc_ref)

    acc_ref[...] += jnp.dot(x_ref[...], w_ref[...],
                            preferred_element_type=jnp.float32)

    @pl.when(pl.program_id(2) == pl.num_programs(2) - 1)
    def _finalize():
        h = _leaky_relu(acc_ref[...])
        o_ref[...] = h.astype(o_ref.dtype)
        os_ref[...] = (att_ref[...] * h).astype(os_ref.dtype)


def _dual_matmul_kernel(x1_ref, w1_ref, x2_ref, w2_ref, o_ref, *, act):
    """o = [leaky_relu](x1 @ w1 + x2 @ w2)  (split-weight / split-K form)."""
    r = jnp.dot(x1_ref[...], w1_ref[...], preferred_element_type=jnp.float32)
    r = r + jnp.dot(x2_ref[...], w2_ref[...], preferred_element_type=jnp.float32)
    if act:
        r = _leaky_relu(r)
    o_ref[...] = r.astype(o_ref.dtype)


# --------------------------------------------------------------------------
# pallas_call wrappers
# --------------------------------------------------------------------------
def _tiled_matmul(x, w, *, act=False, tm=_TM, tn=_TN, tk=_TK):
    M, K = x.shape
    Kw, N = w.shape
    assert K == Kw
    tm, tn, tk = _tile(M, tm), _tile(N, tn), _tile(K, tk)
    grid = (M // tm, N // tn, K // tk)
    return pl.pallas_call(
        functools.partial(_matmul_kernel, act=act),
        out_shape=jax.ShapeDtypeStruct((M, N), x.dtype),
        grid_spec=pltpu.PrefetchScalarGridSpec(
            num_scalar_prefetch=0,
            grid=grid,
            in_specs=[pl.BlockSpec((tm, tk), lambda i, j, k: (i, k)),
                      pl.BlockSpec((tk, tn), lambda i, j, k: (k, j))],
            out_specs=pl.BlockSpec((tm, tn), lambda i, j, k: (i, j)),
            scratch_shapes=[pltpu.VMEM((tm, tn), jnp.float32)]),
        compiler_params=pltpu.CompilerParams(
            dimension_semantics=("parallel", "parallel", "arbitrary"),
            vmem_limit_bytes=_VMEM_LIMIT),
    )(x, w)


def _tiled_matmul_act_scale(x, w, att_col, *, tm=_TM, tn=_TN, tk=_TK):
    M, K = x.shape
    Kw, N = w.shape
    assert K == Kw and att_col.shape == (M, 1)
    tm, tn, tk = _tile(M, tm), _tile(N, tn), _tile(K, tk)
    grid = (M // tm, N // tn, K // tk)
    out = jax.ShapeDtypeStruct((M, N), x.dtype)
    return pl.pallas_call(
        _matmul_act_scale_kernel,
        out_shape=(out, out),
        grid_spec=pltpu.PrefetchScalarGridSpec(
            num_scalar_prefetch=0,
            grid=grid,
            in_specs=[pl.BlockSpec((tm, tk), lambda i, j, k: (i, k)),
                      pl.BlockSpec((tk, tn), lambda i, j, k: (k, j)),
                      pl.BlockSpec((tm, 1), lambda i, j, k: (i, 0))],
            out_specs=(pl.BlockSpec((tm, tn), lambda i, j, k: (i, j)),
                       pl.BlockSpec((tm, tn), lambda i, j, k: (i, j))),
            scratch_shapes=[pltpu.VMEM((tm, tn), jnp.float32)]),
        compiler_params=pltpu.CompilerParams(
            dimension_semantics=("parallel", "parallel", "arbitrary"),
            vmem_limit_bytes=_VMEM_LIMIT),
    )(x, w, att_col)


def _dual_matmul(x1, w1, x2, w2, *, act, tm=_TM, tn=_TN):
    M, K1 = x1.shape
    K1w, N = w1.shape
    M2, K2 = x2.shape
    K2w, N2 = w2.shape
    assert K1 == K1w and K2 == K2w and M == M2 and N == N2
    tm, tn = _tile(M, tm), _tile(N, tn)
    grid = (M // tm, N // tn)
    return pl.pallas_call(
        functools.partial(_dual_matmul_kernel, act=act),
        out_shape=jax.ShapeDtypeStruct((M, N), x1.dtype),
        grid_spec=pltpu.PrefetchScalarGridSpec(
            num_scalar_prefetch=0,
            grid=grid,
            in_specs=[pl.BlockSpec((tm, K1), lambda i, j: (i, 0)),
                      pl.BlockSpec((K1, tn), lambda i, j: (0, j)),
                      pl.BlockSpec((tm, K2), lambda i, j: (i, 0)),
                      pl.BlockSpec((K2, tn), lambda i, j: (0, j))],
            out_specs=pl.BlockSpec((tm, tn), lambda i, j: (i, j))),
        compiler_params=pltpu.CompilerParams(
            dimension_semantics=("parallel", "parallel"),
            vmem_limit_bytes=_VMEM_LIMIT),
    )(x1, w1, x2, w2)


# --------------------------------------------------------------------------
# Forward pass
# --------------------------------------------------------------------------
def napgcn_forward(adj_DM, adj_D, adj_M, drg_embed, mic_embed, mix_embed, params):
    """Pallas-backed NAPGCN.forward; returns the module's 6-tuple of outputs."""
    wd1, wd2, wm1, wm2, dm1, dm2, att = (
        params["wd1"], params["wd2"], params["wm1"], params["wm2"],
        params["dm1"], params["dm2"], params["att"])

    Nd = adj_D.shape[0]
    Nm = adj_M.shape[0]
    F = drg_embed.shape[1]
    H1 = wd1.shape[1]
    H2 = wd2.shape[1]

    NdP, NmP = _round_up(Nd, _LANE), _round_up(Nm, _LANE)
    FP, H1P, H2P = (_round_up(d, _LANE) for d in (F, H1, H2))

    # Zero-padded inputs / parameters (padded adj rows/cols and weight
    # rows/cols are zero, LeakyReLU(0)=0, so padding never leaks into real
    # output entries).
    adjD = _pad2d(adj_D, NdP, NdP)
    adjM = _pad2d(adj_M, NmP, NmP)
    # adj_DM split at the drug/microbe column boundary and block-padded on the
    # row axis so hetero outputs come out as [drug_pad ; mic_pad] row blocks.
    adjL = jnp.concatenate([_pad2d(adj_DM[:Nd, :Nd], NdP, NdP),
                            _pad2d(adj_DM[Nd:, :Nd], NmP, NdP)], axis=0)
    adjR = jnp.concatenate([_pad2d(adj_DM[:Nd, Nd:], NdP, NmP),
                            _pad2d(adj_DM[Nd:, Nd:], NmP, NmP)], axis=0)

    drg = _pad2d(drg_embed, NdP, FP)
    mic = _pad2d(mic_embed, NmP, FP)
    mix_t = _pad2d(mix_embed[:Nd], NdP, FP)
    mix_b = _pad2d(mix_embed[Nd:], NmP, FP)
    att_d = _pad2d(att[:Nd], NdP, 1)
    att_m = _pad2d(att[Nd:], NmP, 1)

    wd1p, wd2p = _pad2d(wd1, FP, H1P), _pad2d(wd2, H1P, H2P)
    wm1p, wm2p = _pad2d(wm1, FP, H1P), _pad2d(wm2, H1P, H2P)
    dm1t, dm1b = _pad2d(dm1[:F], FP, H1P), _pad2d(dm1[F:], H1P, H1P)
    dm2t, dm2b = _pad2d(dm2[:H1], H1P, H2P), _pad2d(dm2[H1:], H2P, H2P)

    # --- homogeneous drug branch: act(adj_D @ (X @ W)) (re-associated) ---
    drg1, drg1s = _tiled_matmul_act_scale(adjD, _tiled_matmul(drg, wd1p), att_d)
    drg2, drg2s = _tiled_matmul_act_scale(adjD, _tiled_matmul(drg1, wd2p), att_d)

    # --- homogeneous microbe branch ---
    mic1, mic1s = _tiled_matmul_act_scale(adjM, _tiled_matmul(mic, wm1p), att_m)
    mic2, mic2s = _tiled_matmul_act_scale(adjM, _tiled_matmul(mic1, wm2p), att_m)

    # --- heterogeneous 1-hop ---
    # cat([mix, att*cat([drg1,mic1],0)],1) @ dm1
    #   == mix @ dm1[:F] + (att*[drg1;mic1]) @ dm1[F:]    (split weight)
    y1_t = _dual_matmul(mix_t, dm1t, drg1s, dm1b, act=False)
    y1_b = _dual_matmul(mix_b, dm1t, mic1s, dm1b, act=False)
    # adj_DM @ Y1 == adj_DM[:, :Nd] @ Y1_top + adj_DM[:, Nd:] @ Y1_bot
    dm1hop_p = _dual_matmul(adjL, y1_t, adjR, y1_b, act=True)    # (NdP+NmP, H1P)

    # --- heterogeneous 2-hop ---
    y2_t = _dual_matmul(dm1hop_p[:NdP], dm2t, drg2s, dm2b, act=False)
    y2_b = _dual_matmul(dm1hop_p[NdP:], dm2t, mic2s, dm2b, act=False)
    dm2hop_p = _dual_matmul(adjL, y2_t, adjR, y2_b, act=True)    # (NdP+NmP, H2P)

    # Strip padding back to the module's output shapes.
    drg1hop = drg1[:Nd, :H1]
    drg2hop = drg2[:Nd, :H2]
    mic1hop = mic1[:Nm, :H1]
    mic2hop = mic2[:Nm, :H2]
    dm1hop = jnp.concatenate([dm1hop_p[:Nd, :H1],
                              dm1hop_p[NdP:NdP + Nm, :H1]], axis=0)
    dm2hop = jnp.concatenate([dm2hop_p[:Nd, :H2],
                              dm2hop_p[NdP:NdP + Nm, :H2]], axis=0)
    return drg1hop, drg2hop, mic1hop, mic2hop, dm1hop, dm2hop


def napgcn_reference(adj_DM, adj_D, adj_M, drg_embed, mic_embed, mix_embed, params):
    """Pure-JAX reference matching the PyTorch forward exactly (left-assoc)."""
    hp = jax.lax.Precision.HIGHEST
    mm = lambda a, b: jnp.dot(a, b, precision=hp)
    act = lambda x: jnp.where(x > 0, x, NEG_SLOPE * x)
    wd1, wd2, wm1, wm2, dm1, dm2, att = (
        params["wd1"], params["wd2"], params["wm1"], params["wm2"],
        params["dm1"], params["dm2"], params["att"])
    drg1hop = act(mm(mm(adj_D, drg_embed), wd1))
    drg2hop = act(mm(mm(adj_D, drg1hop), wd2))
    mic1hop = act(mm(mm(adj_M, mic_embed), wm1))
    mic2hop = act(mm(mm(adj_M, mic1hop), wm2))
    embed1 = att * jnp.concatenate([drg1hop, mic1hop], axis=0)
    mix_cat = jnp.concatenate([mix_embed, embed1], axis=1)
    dm1hop = act(mm(mm(adj_DM, mix_cat), dm1))
    embed2 = att * jnp.concatenate([drg2hop, mic2hop], axis=0)
    dm1hop1 = jnp.concatenate([dm1hop, embed2], axis=1)
    dm2hop = act(mm(mm(adj_DM, dm1hop1), dm2))
    return drg1hop, drg2hop, mic1hop, mic2hop, dm1hop, dm2hop


if __name__ == "__main__":
    # Small shapes consistent with the module (original: Nd=Nm=773, N=F=1546,
    # H1=1024, H2=512). Chosen so padding (to 128) and multi-tile grids
    # (K-accumulation, multi-row-tile hetero layers) are exercised.
    Nd, Nm = 12, 12
    N = Nd + Nm          # 24
    F = 200
    H1, H2 = 96, 40

    key = jax.random.PRNGKey(0)
    ks = jax.random.split(key, 13)
    f32 = jnp.float32

    adj_DM = jax.random.normal(ks[0], (N, N), f32)
    adj_D = jax.random.normal(ks[1], (Nd, Nd), f32)
    adj_M = jax.random.normal(ks[2], (Nm, Nm), f32)
    drg_embed = jax.random.normal(ks[3], (Nd, F), f32)
    mic_embed = jax.random.normal(ks[4], (Nm, F), f32)
    mix_embed = jax.random.normal(ks[5], (N, F), f32)

    params = {
        "wd1": jax.random.normal(ks[6], (F, H1), f32),
        "wd2": jax.random.normal(ks[7], (H1, H2), f32),
        "wm1": jax.random.normal(ks[8], (F, H1), f32),
        "wm2": jax.random.normal(ks[9], (H1, H2), f32),
        "dm1": jax.random.normal(ks[10], (F + H1, H1), f32),
        "dm2": jax.random.normal(ks[11], (H1 + H2, H2), f32),
        "att": jax.random.normal(ks[12], (N, 1), f32),
    }

    fwd = jax.jit(napgcn_forward)
    outs = jax.block_until_ready(
        fwd(adj_DM, adj_D, adj_M, drg_embed, mic_embed, mix_embed, params))

    refs = napgcn_reference(adj_DM, adj_D, adj_M, drg_embed, mic_embed,
                            mix_embed, params)

    names = ("drg1hop", "drg2hop", "mic1hop", "mic2hop", "dm1hop", "dm2hop")
    for name, o, r in zip(names, outs, refs):
        assert o.shape == r.shape and o.dtype == r.dtype, name
        err = float(jnp.max(jnp.abs(o - r)))
        scale = float(jnp.max(jnp.abs(r))) + 1e-6
        assert err <= 2e-3 * scale, f"{name}: rel err {err / scale:.3e}"

    print("KERNEL_OK")
</pallas_src>

<mosaic_0001>
module attributes {stable_mosaic.version = 11 : i64} {
  func.func @_matmul_kernel(%arg0: i32, %arg1: i32, %arg2: i32, %arg3: memref<128x128xf32, #tpu.memory_space<vmem>>, %arg4: memref<128x128xf32, #tpu.memory_space<vmem>>, %arg5: memref<128x128xf32, #tpu.memory_space<vmem>>, %arg6: memref<128x128xf32, #tpu.memory_space<vmem>>) attributes {dimension_semantics = [#tpu.dimension_semantics<parallel>, #tpu.dimension_semantics<parallel>, #tpu.dimension_semantics<arbitrary>], iteration_bounds = array<i64: 1, 1, 2>, scalar_prefetch = 0 : i64, scratch_operands = 1 : i64, tpu.core_type = #tpu.core_type<tc>, window_params = [{transform_indices = @transform_0, window_bounds = array<i64: 128, 128>}, {transform_indices = @transform_1, window_bounds = array<i64: 128, 128>}, {transform_indices = @transform_2, window_bounds = array<i64: 128, 128>}]} {
    %c0_i32 = arith.constant 0 : i32
    %0 = arith.cmpi eq, %arg2, %c0_i32 : i32
    %1 = arith.extui %0 : i1 to i32
    %c0_i32_0 = arith.constant 0 : i32
    %2 = arith.cmpi ne, %1, %c0_i32_0 : i32
    scf.if %2 {
      %cst_9 = arith.constant 0.000000e+00 : f32
      %12 = vector.broadcast %cst_9 : f32 to vector<128x128xf32>
      %c0_10 = arith.constant 0 : index
      %c0_11 = arith.constant 0 : index
      %13 = vector.load %arg6[%c0_10, %c0_11] : memref<128x128xf32, #tpu.memory_space<vmem>>, vector<128x128xf32>
      tpu.vector_store %arg6[%c0_10, %c0_11], %12 {strides = array<i32>} : memref<128x128xf32, #tpu.memory_space<vmem>>, vector<128x128xf32>,
    } else {
    }
    %c0 = arith.constant 0 : index
    %c0_1 = arith.constant 0 : index
    %3 = vector.load %arg6[%c0, %c0_1] : memref<128x128xf32, #tpu.memory_space<vmem>>, vector<128x128xf32>
    %c0_2 = arith.constant 0 : index
    %c0_3 = arith.constant 0 : index
    %4 = vector.load %arg3[%c0_2, %c0_3] : memref<128x128xf32, #tpu.memory_space<vmem>>, vector<128x128xf32>
    %c0_4 = arith.constant 0 : index
    %c0_5 = arith.constant 0 : index
    %5 = vector.load %arg4[%c0_4, %c0_5] : memref<128x128xf32, #tpu.memory_space<vmem>>, vector<128x128xf32>
    %cst = arith.constant dense<0.000000e+00> : vector<128x128xf32>
    %6 = tpu.matmul %4, %5, %cst {dimension_numbers = #tpu.dot_dimension_numbers<[1], [0], [0], [1], [0, 0, 1, 1], [], []>} : vector<128x128xf32>, vector<128x128xf32>, vector<128x128xf32> -> vector<128x128xf32>
    %7 = arith.addf %3, %6 : vector<128x128xf32>
    %c0_6 = arith.constant 0 : index
    %c0_7 = arith.constant 0 : index
    %8 = vector.load %arg6[%c0_6, %c0_7] : memref<128x128xf32, #tpu.memory_space<vmem>>, vector<128x128xf32>
    tpu.vector_store %arg6[%c0_6, %c0_7], %7 {strides = array<i32>} : memref<128x128xf32, #tpu.memory_space<vmem>>, vector<128x128xf32>,
    %c1_i32 = arith.constant 1 : i32
    %9 = arith.cmpi eq, %arg2, %c1_i32 : i32
    %10 = arith.extui %9 : i1 to i32
    %c0_i32_8 = arith.constant 0 : i32
    %11 = arith.cmpi ne, %10, %c0_i32_8 : i32
    scf.if %11 {
      %c0_9 = arith.constant 0 : index
      %c0_10 = arith.constant 0 : index
      %12 = vector.load %arg6[%c0_9, %c0_10] : memref<128x128xf32, #tpu.memory_space<vmem>>, vector<128x128xf32>
      %c0_11 = arith.constant 0 : index
      %c0_12 = arith.constant 0 : index
      %13 = vector.load %arg5[%c0_11, %c0_12] : memref<128x128xf32, #tpu.memory_space<vmem>>, vector<128x128xf32>
      tpu.vector_store %arg5[%c0_11, %c0_12], %12 {strides = array<i32>} : memref<128x128xf32, #tpu.memory_space<vmem>>, vector<128x128xf32>,
    } else {
    }
    return
  }
  func.func @transform_0(%arg0: i32, %arg1: i32, %arg2: i32) -> (i32, i32) {
    %c0_i32 = arith.constant 0 : i32
    return %arg0, %arg2 : i32, i32
  }
  func.func @transform_1(%arg0: i32, %arg1: i32, %arg2: i32) -> (i32, i32) {
    %c0_i32 = arith.constant 0 : i32
    return %arg2, %arg1 : i32, i32
  }
  func.func @transform_2(%arg0: i32, %arg1: i32, %arg2: i32) -> (i32, i32) {
    %c0_i32 = arith.constant 0 : i32
    return %arg0, %arg1 : i32, i32
  }
}

module attributes {stable_mosaic.version = 11 : i64} {
  func.func @_matmul_kernel(%arg0: i32, %arg1: i32, %arg2: i32, %arg3: memref<128x128xf32, #tpu.memory_space<vmem>>, %arg4: memref<128x128xf32, #tpu.memory_space<vmem>>, %arg5: memref<128x128xf32, #tpu.memory_space<vmem>>, %arg6: memref<128x128xf32, #tpu.memory_space<vmem>>) attributes {dimension_semantics = [#tpu.dimension_semantics<parallel>, #tpu.dimension_semantics<parallel>, #tpu.dimension_semantics<arbitrary>], iteration_bounds = array<i64: 1, 1, 1>, scalar_prefetch = 0 : i64, scratch_operands = 1 : i64, tpu.core_type = #tpu.core_type<tc>, window_params = [{transform_indices = @transform_0, window_bounds = array<i64: 128, 128>}, {transform_indices = @transform_1, window_bounds = array<i64: 128, 128>}, {transform_indices = @transform_2, window_bounds = array<i64: 128, 128>}]} {
    %c0_i32 = arith.constant 0 : i32
    %0 = arith.cmpi eq, %arg2, %c0_i32 : i32
    %1 = arith.extui %0 : i1 to i32
    %c0_i32_0 = arith.constant 0 : i32
    %2 = arith.cmpi ne, %1, %c0_i32_0 : i32
    scf.if %2 {
      %cst_10 = arith.constant 0.000000e+00 : f32
      %12 = vector.broadcast %cst_10 : f32 to vector<128x128xf32>
      %c0_11 = arith.constant 0 : index
      %c0_12 = arith.constant 0 : index
      %13 = vector.load %arg6[%c0_11, %c0_12] : memref<128x128xf32, #tpu.memory_space<vmem>>, vector<128x128xf32>
      tpu.vector_store %arg6[%c0_11, %c0_12], %12 {strides = array<i32>} : memref<128x128xf32, #tpu.memory_space<vmem>>, vector<128x128xf32>,
    } else {
    }
    %c0 = arith.constant 0 : index
    %c0_1 = arith.constant 0 : index
    %3 = vector.load %arg6[%c0, %c0_1] : memref<128x128xf32, #tpu.memory_space<vmem>>, vector<128x128xf32>
    %c0_2 = arith.constant 0 : index
    %c0_3 = arith.constant 0 : index
    %4 = vector.load %arg3[%c0_2, %c0_3] : memref<128x128xf32, #tpu.memory_space<vmem>>, vector<128x128xf32>
    %c0_4 = arith.constant 0 : index
    %c0_5 = arith.constant 0 : index
    %5 = vector.load %arg4[%c0_4, %c0_5] : memref<128x128xf32, #tpu.memory_space<vmem>>, vector<128x128xf32>
    %cst = arith.constant dense<0.000000e+00> : vector<128x128xf32>
    %6 = tpu.matmul %4, %5, %cst {dimension_numbers = #tpu.dot_dimension_numbers<[1], [0], [0], [1], [0, 0, 1, 1], [], []>} : vector<128x128xf32>, vector<128x128xf32>, vector<128x128xf32> -> vector<128x128xf32>
    %7 = arith.addf %3, %6 : vector<128x128xf32>
    %c0_6 = arith.constant 0 : index
    %c0_7 = arith.constant 0 : index
    %8 = vector.load %arg6[%c0_6, %c0_7] : memref<128x128xf32, #tpu.memory_space<vmem>>, vector<128x128xf32>
    tpu.vector_store %arg6[%c0_6, %c0_7], %7 {strides = array<i32>} : memref<128x128xf32, #tpu.memory_space<vmem>>, vector<128x128xf32>,
    %c0_i32_8 = arith.constant 0 : i32
    %9 = arith.cmpi eq, %arg2, %c0_i32_8 : i32
    %10 = arith.extui %9 : i1 to i32
    %c0_i32_9 = arith.constant 0 : i32
    %11 = arith.cmpi ne, %10, %c0_i32_9 : i32
    scf.if %11 {
      %c0_10 = arith.constant 0 : index
      %c0_11 = arith.constant 0 : index
      %12 = vector.load %arg6[%c0_10, %c0_11] : memref<128x128xf32, #tpu.memory_space<vmem>>, vector<128x128xf32>
      %c0_12 = arith.constant 0 : index
      %c0_13 = arith.constant 0 : index
      %13 = vector.load %arg5[%c0_12, %c0_13] : memref<128x128xf32, #tpu.memory_space<vmem>>, vector<128x128xf32>
      tpu.vector_store %arg5[%c0_12, %c0_13], %12 {strides = array<i32>} : memref<128x128xf32, #tpu.memory_space<vmem>>, vector<128x128xf32>,
    } else {
    }
    return
  }
  func.func @transform_0(%arg0: i32, %arg1: i32, %arg2: i32) -> (i32, i32) {
    %c0_i32 = arith.constant 0 : i32
    return %arg0, %arg2 : i32, i32
  }
  func.func @transform_1(%arg0: i32, %arg1: i32, %arg2: i32) -> (i32, i32) {
    %c0_i32 = arith.constant 0 : i32
    return %arg2, %arg1 : i32, i32
  }
  func.func @transform_2(%arg0: i32, %arg1: i32, %arg2: i32) -> (i32, i32) {
    %c0_i32 = arith.constant 0 : i32
    return %arg0, %arg1 : i32, i32
  }
}

module attributes {stable_mosaic.version = 11 : i64} {
  func.func @_matmul_act_scale_kernel(%arg0: i32, %arg1: i32, %arg2: i32, %arg3: memref<128x128xf32, #tpu.memory_space<vmem>>, %arg4: memref<128x128xf32, #tpu.memory_space<vmem>>, %arg5: memref<128x1xf32, #tpu.memory_space<vmem>>, %arg6: memref<128x128xf32, #tpu.memory_space<vmem>>, %arg7: memref<128x128xf32, #tpu.memory_space<vmem>>, %arg8: memref<128x128xf32, #tpu.memory_space<vmem>>) attributes {dimension_semantics = [#tpu.dimension_semantics<parallel>, #tpu.dimension_semantics<parallel>, #tpu.dimension_semantics<arbitrary>], iteration_bounds = array<i64: 1, 1, 1>, scalar_prefetch = 0 : i64, scratch_operands = 1 : i64, tpu.core_type = #tpu.core_type<tc>, window_params = [{transform_indices = @transform_0, window_bounds = array<i64: 128, 128>}, {transform_indices = @transform_1, window_bounds = array<i64: 128, 128>}, {transform_indices = @transform_2, window_bounds = array<i64: 128, 1>}, {transform_indices = @transform_3, window_bounds = array<i64: 128, 128>}, {transform_indices = @transform_4, window_bounds = array<i64: 128, 128>}]} {
    %c0_i32 = arith.constant 0 : i32
    %0 = arith.cmpi eq, %arg2, %c0_i32 : i32
    %1 = arith.extui %0 : i1 to i32
    %c0_i32_0 = arith.constant 0 : i32
    %2 = arith.cmpi ne, %1, %c0_i32_0 : i32
    scf.if %2 {
      %cst_10 = arith.constant 0.000000e+00 : f32
      %12 = vector.broadcast %cst_10 : f32 to vector<128x128xf32>
      %c0_11 = arith.constant 0 : index
      %c0_12 = arith.constant 0 : index
      %13 = vector.load %arg8[%c0_11, %c0_12] : memref<128x128xf32, #tpu.memory_space<vmem>>, vector<128x128xf32>
      tpu.vector_store %arg8[%c0_11, %c0_12], %12 {strides = array<i32>} : memref<128x128xf32, #tpu.memory_space<vmem>>, vector<128x128xf32>,
    } else {
    }
    %c0 = arith.constant 0 : index
    %c0_1 = arith.constant 0 : index
    %3 = vector.load %arg8[%c0, %c0_1] : memref<128x128xf32, #tpu.memory_space<vmem>>, vector<128x128xf32>
    %c0_2 = arith.constant 0 : index
    %c0_3 = arith.constant 0 : index
    %4 = vector.load %arg3[%c0_2, %c0_3] : memref<128x128xf32, #tpu.memory_space<vmem>>, vector<128x128xf32>
    %c0_4 = arith.constant 0 : index
    %c0_5 = arith.constant 0 : index
    %5 = vector.load %arg4[%c0_4, %c0_5] : memref<128x128xf32, #tpu.memory_space<vmem>>, vector<128x128xf32>
    %cst = arith.constant dense<0.000000e+00> : vector<128x128xf32>
    %6 = tpu.matmul %4, %5, %cst {dimension_numbers = #tpu.dot_dimension_numbers<[1], [0], [0], [1], [0, 0, 1, 1], [], []>} : vector<128x128xf32>, vector<128x128xf32>, vector<128x128xf32> -> vector<128x128xf32>
    %7 = arith.addf %3, %6 : vector<128x128xf32>
    %c0_6 = arith.constant 0 : index
    %c0_7 = arith.constant 0 : index
    %8 = vector.load %arg8[%c0_6, %c0_7] : memref<128x128xf32, #tpu.memory_space<vmem>>, vector<128x128xf32>
    tpu.vector_store %arg8[%c0_6, %c0_7], %7 {strides = array<i32>} : memref<128x128xf32, #tpu.memory_space<vmem>>, vector<128x128xf32>,
    %c0_i32_8 = arith.constant 0 : i32
    %9 = arith.cmpi eq, %arg2, %c0_i32_8 : i32
    %10 = arith.extui %9 : i1 to i32
    %c0_i32_9 = arith.constant 0 : i32
    %11 = arith.cmpi ne, %10, %c0_i32_9 : i32
    scf.if %11 {
      %c0_10 = arith.constant 0 : index
      %c0_11 = arith.constant 0 : index
      %12 = vector.load %arg8[%c0_10, %c0_11] : memref<128x128xf32, #tpu.memory_space<vmem>>, vector<128x128xf32>
      %cst_12 = arith.constant 0.000000e+00 : f32
      %13 = vector.broadcast %cst_12 : f32 to vector<128x128xf32>
      %14 = arith.cmpf ogt, %12, %13 : vector<128x128xf32>
      %cst_13 = arith.constant 0.00999999977 : f32
      %15 = vector.broadcast %cst_13 : f32 to vector<128x128xf32>
      %16 = arith.mulf %15, %12 : vector<128x128xf32>
      %17 = arith.select %14, %12, %16 : vector<128x128xi1>, vector<128x128xf32>
      %c0_14 = arith.constant 0 : index
      %c0_15 = arith.constant 0 : index
      %18 = vector.load %arg6[%c0_14, %c0_15] : memref<128x128xf32, #tpu.memory_space<vmem>>, vector<128x128xf32>
      tpu.vector_store %arg6[%c0_14, %c0_15], %17 {strides = array<i32>} : memref<128x128xf32, #tpu.memory_space<vmem>>, vector<128x128xf32>,
      %c0_16 = arith.constant 0 : index
      %c0_17 = arith.constant 0 : index
      %19 = vector.load %arg5[%c0_16, %c0_17] : memref<128x1xf32, #tpu.memory_space<vmem>>, vector<128x1xf32>
      %20 = vector.broadcast %19 : vector<128x1xf32> to vector<128x128xf32>
      %21 = arith.mulf %20, %17 : vector<128x128xf32>
      %c0_18 = arith.constant 0 : index
      %c0_19 = arith.constant 0 : index
      %22 = vector.load %arg7[%c0_18, %c0_19] : memref<128x128xf32, #tpu.memory_space<vmem>>, vector<128x128xf32>
      tpu.vector_store %arg7[%c0_18, %c0_19], %21 {strides = array<i32>} : memref<128x128xf32, #tpu.memory_space<vmem>>, vector<128x128xf32>,
    } else {
    }
    return
  }
  func.func @transform_0(%arg0: i32, %arg1: i32, %arg2: i32) -> (i32, i32) {
    %c0_i32 = arith.constant 0 : i32
    return %arg0, %arg2 : i32, i32
  }
  func.func @transform_1(%arg0: i32, %arg1: i32, %arg2: i32) -> (i32, i32) {
    %c0_i32 = arith.constant 0 : i32
    return %arg2, %arg1 : i32, i32
  }
  func.func @transform_2(%arg0: i32, %arg1: i32, %arg2: i32) -> (i32, i32) {
    %c0_i32 = arith.constant 0 : i32
    %c0_i32_0 = arith.constant 0 : i32
    return %arg0, %c0_i32 : i32, i32
  }
  func.func @transform_3(%arg0: i32, %arg1: i32, %arg2: i32) -> (i32, i32) {
    %c0_i32 = arith.constant 0 : i32
    return %arg0, %arg1 : i32, i32
  }
  func.func @transform_4(%arg0: i32, %arg1: i32, %arg2: i32) -> (i32, i32) {
    %c0_i32 = arith.constant 0 : i32
    return %arg0, %arg1 : i32, i32
  }
}

module attributes {stable_mosaic.version = 11 : i64} {
  func.func @_dual_matmul_kernel(%arg0: i32, %arg1: i32, %arg2: memref<128x128xf32, #tpu.memory_space<vmem>>, %arg3: memref<128x128xf32, #tpu.memory_space<vmem>>, %arg4: memref<128x128xf32, #tpu.memory_space<vmem>>, %arg5: memref<128x128xf32, #tpu.memory_space<vmem>>, %arg6: memref<128x128xf32, #tpu.memory_space<vmem>>) attributes {dimension_semantics = [#tpu.dimension_semantics<parallel>, #tpu.dimension_semantics<parallel>], iteration_bounds = array<i64: 2, 1>, scalar_prefetch = 0 : i64, scratch_operands = 0 : i64, tpu.core_type = #tpu.core_type<tc>, window_params = [{transform_indices = @transform_0, window_bounds = array<i64: 128, 128>}, {transform_indices = @transform_1, window_bounds = array<i64: 128, 128>}, {transform_indices = @transform_2, window_bounds = array<i64: 128, 128>}, {transform_indices = @transform_3, window_bounds = array<i64: 128, 128>}, {transform_indices = @transform_4, window_bounds = array<i64: 128, 128>}]} {
    %c0 = arith.constant 0 : index
    %c0_0 = arith.constant 0 : index
    %0 = vector.load %arg2[%c0, %c0_0] : memref<128x128xf32, #tpu.memory_space<vmem>>, vector<128x128xf32>
    %c0_1 = arith.constant 0 : index
    %c0_2 = arith.constant 0 : index
    %1 = vector.load %arg3[%c0_1, %c0_2] : memref<128x128xf32, #tpu.memory_space<vmem>>, vector<128x128xf32>
    %cst = arith.constant dense<0.000000e+00> : vector<128x128xf32>
    %2 = tpu.matmul %0, %1, %cst {dimension_numbers = #tpu.dot_dimension_numbers<[1], [0], [0], [1], [0, 0, 1, 1], [], []>} : vector<128x128xf32>, vector<128x128xf32>, vector<128x128xf32> -> vector<128x128xf32>
    %c0_3 = arith.constant 0 : index
    %c0_4 = arith.constant 0 : index
    %3 = vector.load %arg4[%c0_3, %c0_4] : memref<128x128xf32, #tpu.memory_space<vmem>>, vector<128x128xf32>
    %c0_5 = arith.constant 0 : index
    %c0_6 = arith.constant 0 : index
    %4 = vector.load %arg5[%c0_5, %c0_6] : memref<128x128xf32, #tpu.memory_space<vmem>>, vector<128x128xf32>
    %cst_7 = arith.constant dense<0.000000e+00> : vector<128x128xf32>
    %5 = tpu.matmul %3, %4, %cst_7 {dimension_numbers = #tpu.dot_dimension_numbers<[1], [0], [0], [1], [0, 0, 1, 1], [], []>} : vector<128x128xf32>, vector<128x128xf32>, vector<128x128xf32> -> vector<128x128xf32>
    %6 = arith.addf %2, %5 : vector<128x128xf32>
    %cst_8 = arith.constant 0.000000e+00 : f32
    %7 = vector.broadcast %cst_8 : f32 to vector<128x128xf32>
    %8 = arith.cmpf ogt, %6, %7 : vector<128x128xf32>
    %cst_9 = arith.constant 0.00999999977 : f32
    %9 = vector.broadcast %cst_9 : f32 to vector<128x128xf32>
    %10 = arith.mulf %9, %6 : vector<128x128xf32>
    %11 = arith.select %8, %6, %10 : vector<128x128xi1>, vector<128x128xf32>
    %c0_10 = arith.constant 0 : index
    %c0_11 = arith.constant 0 : index
    %12 = vector.load %arg6[%c0_10, %c0_11] : memref<128x128xf32, #tpu.memory_space<vmem>>, vector<128x128xf32>
    tpu.vector_store %arg6[%c0_10, %c0_11], %11 {strides = array<i32>} : memref<128x128xf32, #tpu.memory_space<vmem>>, vector<128x128xf32>,
    return
  }
  func.func @transform_0(%arg0: i32, %arg1: i32) -> (i32, i32) {
    %c0_i32 = arith.constant 0 : i32
    %c0_i32_0 = arith.constant 0 : i32
    return %arg0, %c0_i32 : i32, i32
  }
  func.func @transform_1(%arg0: i32, %arg1: i32) -> (i32, i32) {
    %c0_i32 = arith.constant 0 : i32
    %c0_i32_0 = arith.constant 0 : i32
    return %c0_i32, %arg1 : i32, i32
  }
  func.func @transform_2(%arg0: i32, %arg1: i32) -> (i32, i32) {
    %c0_i32 = arith.constant 0 : i32
    %c0_i32_0 = arith.constant 0 : i32
    return %arg0, %c0_i32 : i32, i32
  }
  func.func @transform_3(%arg0: i32, %arg1: i32) -> (i32, i32) {
    %c0_i32 = arith.constant 0 : i32
    %c0_i32_0 = arith.constant 0 : i32
    return %c0_i32, %arg1 : i32, i32
  }
  func.func @transform_4(%arg0: i32, %arg1: i32) -> (i32, i32) {
    %c0_i32 = arith.constant 0 : i32
    return %arg0, %arg1 : i32, i32
  }
}

module attributes {stable_mosaic.version = 11 : i64} {
  func.func @_dual_matmul_kernel(%arg0: i32, %arg1: i32, %arg2: memref<128x256xf32, #tpu.memory_space<vmem>>, %arg3: memref<256x128xf32, #tpu.memory_space<vmem>>, %arg4: memref<128x128xf32, #tpu.memory_space<vmem>>, %arg5: memref<128x128xf32, #tpu.memory_space<vmem>>, %arg6: memref<128x128xf32, #tpu.memory_space<vmem>>) attributes {dimension_semantics = [#tpu.dimension_semantics<parallel>, #tpu.dimension_semantics<parallel>], iteration_bounds = array<i64: 1, 1>, scalar_prefetch = 0 : i64, scratch_operands = 0 : i64, tpu.core_type = #tpu.core_type<tc>, window_params = [{transform_indices = @transform_0, window_bounds = array<i64: 128, 256>}, {transform_indices = @transform_1, window_bounds = array<i64: 256, 128>}, {transform_indices = @transform_2, window_bounds = array<i64: 128, 128>}, {transform_indices = @transform_3, window_bounds = array<i64: 128, 128>}, {transform_indices = @transform_4, window_bounds = array<i64: 128, 128>}]} {
    %c0 = arith.constant 0 : index
    %c0_0 = arith.constant 0 : index
    %0 = vector.load %arg2[%c0, %c0_0] : memref<128x256xf32, #tpu.memory_space<vmem>>, vector<128x256xf32>
    %c0_1 = arith.constant 0 : index
    %c0_2 = arith.constant 0 : index
    %1 = vector.load %arg3[%c0_1, %c0_2] : memref<256x128xf32, #tpu.memory_space<vmem>>, vector<256x128xf32>
    %cst = arith.constant dense<0.000000e+00> : vector<128x128xf32>
    %2 = tpu.matmul %0, %1, %cst {dimension_numbers = #tpu.dot_dimension_numbers<[1], [0], [0], [1], [0, 0, 1, 1], [], []>} : vector<128x256xf32>, vector<256x128xf32>, vector<128x128xf32> -> vector<128x128xf32>
    %c0_3 = arith.constant 0 : index
    %c0_4 = arith.constant 0 : index
    %3 = vector.load %arg4[%c0_3, %c0_4] : memref<128x128xf32, #tpu.memory_space<vmem>>, vector<128x128xf32>
    %c0_5 = arith.constant 0 : index
    %c0_6 = arith.constant 0 : index
    %4 = vector.load %arg5[%c0_5, %c0_6] : memref<128x128xf32, #tpu.memory_space<vmem>>, vector<128x128xf32>
    %cst_7 = arith.constant dense<0.000000e+00> : vector<128x128xf32>
    %5 = tpu.matmul %3, %4, %cst_7 {dimension_numbers = #tpu.dot_dimension_numbers<[1], [0], [0], [1], [0, 0, 1, 1], [], []>} : vector<128x128xf32>, vector<128x128xf32>, vector<128x128xf32> -> vector<128x128xf32>
    %6 = arith.addf %2, %5 : vector<128x128xf32>
    %c0_8 = arith.constant 0 : index
    %c0_9 = arith.constant 0 : index
    %7 = vector.load %arg6[%c0_8, %c0_9] : memref<128x128xf32, #tpu.memory_space<vmem>>, vector<128x128xf32>
    tpu.vector_store %arg6[%c0_8, %c0_9], %6 {strides = array<i32>} : memref<128x128xf32, #tpu.memory_space<vmem>>, vector<128x128xf32>,
    return
  }
  func.func @transform_0(%arg0: i32, %arg1: i32) -> (i32, i32) {
    %c0_i32 = arith.constant 0 : i32
    %c0_i32_0 = arith.constant 0 : i32
    return %arg0, %c0_i32 : i32, i32
  }
  func.func @transform_1(%arg0: i32, %arg1: i32) -> (i32, i32) {
    %c0_i32 = arith.constant 0 : i32
    %c0_i32_0 = arith.constant 0 : i32
    return %c0_i32, %arg1 : i32, i32
  }
  func.func @transform_2(%arg0: i32, %arg1: i32) -> (i32, i32) {
    %c0_i32 = arith.constant 0 : i32
    %c0_i32_0 = arith.constant 0 : i32
    return %arg0, %c0_i32 : i32, i32
  }
  func.func @transform_3(%arg0: i32, %arg1: i32) -> (i32, i32) {
    %c0_i32 = arith.constant 0 : i32
    %c0_i32_0 = arith.constant 0 : i32
    return %c0_i32, %arg1 : i32, i32
  }
  func.func @transform_4(%arg0: i32, %arg1: i32) -> (i32, i32) {
    %c0_i32 = arith.constant 0 : i32
    return %arg0, %arg1 : i32, i32
  }
}

module attributes {stable_mosaic.version = 11 : i64} {
  func.func @_dual_matmul_kernel(%arg0: i32, %arg1: i32, %arg2: memref<128x128xf32, #tpu.memory_space<vmem>>, %arg3: memref<128x128xf32, #tpu.memory_space<vmem>>, %arg4: memref<128x128xf32, #tpu.memory_space<vmem>>, %arg5: memref<128x128xf32, #tpu.memory_space<vmem>>, %arg6: memref<128x128xf32, #tpu.memory_space<vmem>>) attributes {dimension_semantics = [#tpu.dimension_semantics<parallel>, #tpu.dimension_semantics<parallel>], iteration_bounds = array<i64: 1, 1>, scalar_prefetch = 0 : i64, scratch_operands = 0 : i64, tpu.core_type = #tpu.core_type<tc>, window_params = [{transform_indices = @transform_0, window_bounds = array<i64: 128, 128>}, {transform_indices = @transform_1, window_bounds = array<i64: 128, 128>}, {transform_indices = @transform_2, window_bounds = array<i64: 128, 128>}, {transform_indices = @transform_3, window_bounds = array<i64: 128, 128>}, {transform_indices = @transform_4, window_bounds = array<i64: 128, 128>}]} {
    %c0 = arith.constant 0 : index
    %c0_0 = arith.constant 0 : index
    %0 = vector.load %arg2[%c0, %c0_0] : memref<128x128xf32, #tpu.memory_space<vmem>>, vector<128x128xf32>
    %c0_1 = arith.constant 0 : index
    %c0_2 = arith.constant 0 : index
    %1 = vector.load %arg3[%c0_1, %c0_2] : memref<128x128xf32, #tpu.memory_space<vmem>>, vector<128x128xf32>
    %cst = arith.constant dense<0.000000e+00> : vector<128x128xf32>
    %2 = tpu.matmul %0, %1, %cst {dimension_numbers = #tpu.dot_dimension_numbers<[1], [0], [0], [1], [0, 0, 1, 1], [], []>} : vector<128x128xf32>, vector<128x128xf32>, vector<128x128xf32> -> vector<128x128xf32>
    %c0_3 = arith.constant 0 : index
    %c0_4 = arith.constant 0 : index
    %3 = vector.load %arg4[%c0_3, %c0_4] : memref<128x128xf32, #tpu.memory_space<vmem>>, vector<128x128xf32>
    %c0_5 = arith.constant 0 : index
    %c0_6 = arith.constant 0 : index
    %4 = vector.load %arg5[%c0_5, %c0_6] : memref<128x128xf32, #tpu.memory_space<vmem>>, vector<128x128xf32>
    %cst_7 = arith.constant dense<0.000000e+00> : vector<128x128xf32>
    %5 = tpu.matmul %3, %4, %cst_7 {dimension_numbers = #tpu.dot_dimension_numbers<[1], [0], [0], [1], [0, 0, 1, 1], [], []>} : vector<128x128xf32>, vector<128x128xf32>, vector<128x128xf32> -> vector<128x128xf32>
    %6 = arith.addf %2, %5 : vector<128x128xf32>
    %c0_8 = arith.constant 0 : index
    %c0_9 = arith.constant 0 : index
    %7 = vector.load %arg6[%c0_8, %c0_9] : memref<128x128xf32, #tpu.memory_space<vmem>>, vector<128x128xf32>
    tpu.vector_store %arg6[%c0_8, %c0_9], %6 {strides = array<i32>} : memref<128x128xf32, #tpu.memory_space<vmem>>, vector<128x128xf32>,
    return
  }
  func.func @transform_0(%arg0: i32, %arg1: i32) -> (i32, i32) {
    %c0_i32 = arith.constant 0 : i32
    %c0_i32_0 = arith.constant 0 : i32
    return %arg0, %c0_i32 : i32, i32
  }
  func.func @transform_1(%arg0: i32, %arg1: i32) -> (i32, i32) {
    %c0_i32 = arith.constant 0 : i32
    %c0_i32_0 = arith.constant 0 : i32
    return %c0_i32, %arg1 : i32, i32
  }
  func.func @transform_2(%arg0: i32, %arg1: i32) -> (i32, i32) {
    %c0_i32 = arith.constant 0 : i32
    %c0_i32_0 = arith.constant 0 : i32
    return %arg0, %c0_i32 : i32, i32
  }
  func.func @transform_3(%arg0: i32, %arg1: i32) -> (i32, i32) {
    %c0_i32 = arith.constant 0 : i32
    %c0_i32_0 = arith.constant 0 : i32
    return %c0_i32, %arg1 : i32, i32
  }
  func.func @transform_4(%arg0: i32, %arg1: i32) -> (i32, i32) {
    %c0_i32 = arith.constant 0 : i32
    return %arg0, %arg1 : i32, i32
  }
}

</mosaic_0001>

<bundles_post_ra>
// kernel: napgcn_forward.14
= control target key start
LH: loop header
LB: loop body
LE: loop exit
PB: predicated region body
PF: predicated region fallthrough
CT: control target
= control target key end

     0   :  { %s932_s9 = smov 0   ;;  %s934_s10 = smov 0   ;;  %s1101_s0 = inlined_call_operand.vmem [shape: f32[128,256], index: 0, kind: input, shape index: {}]   ;;  %s1102_s1 = inlined_call_operand.vmem [shape: f32[256,128], index: 1, kind: input, shape index: {}]   ;;  %s1103_s2 = inlined_call_operand.vmem [shape: f32[128,128], index: 2, kind: output, shape index: {}]  }
   0x1   :  { %s936_s11 = smov 0   ;;  %s938_s12 = smov 0  }
   0x2   :  { %s940_s13 = smov 0  }
   0x3 LB: > { %s24_s14 = sadd.s32 1, %s910_s12  ;;  %p47_p1 = scmp.ne.s32.totalorder %s902_s10, %s898_s9  ;;  %s914_s13 = sphi %s940_s13, %s12_s13   ;;  %s910_s12 = sphi %s938_s12, %s1107_s12   ;;  %s906_s11 = sphi %s936_s11, %s1106_s11   ;;  %s902_s10 = sphi %s934_s10, %s1105_s10   ;;  %s898_s9 = sphi %s932_s9, %s1104_s9  }
   0x4   : > { %p25_p0 = scmp.ge.s32.totalorder %s24_s14, 2  ;;  %p48_p2 = scmp.eq.s32.totalorder %s914_s13, 0 }
   0x5   : > { %s40_s16 = sadd.s32 1, %s902_s10  ;;  %p686_p5 = scmp.ge.s32.totalorder %s914_s13, 2 }
   0x6   : > { %s1109_s14 = smov (%p25_p0, %s24_s14), 0  ;;  %p49_p3 = por %p48_p2, %p47_p1 }
   0x7   : > { %s36_s15 = ssub.s32 %s910_s12, %s1109_s14  ;;  %129 = sbr.rel (%p686_p5) target bundleno = 26 (0x1a), region = 16 }
   0x8   : > { %p38_p4 = scmp.eq.s32.totalorder %s36_s15, 0 }
   0xa   : > { %s967_s17 = scalar_select %p38_p4, %s902_s10, %s40_s16  }
   0xe   : > { %132 = sbr.rel (!%p49_p3) target bundleno = 26 (0x1a), region = 20  ;;  %s134_s18 = sand.u32 (%p49_p3), 1, %s902_s10  }
   0xf   : > { %s688_s19 = sshll.u32 (%p49_p3), %s910_s12, 3  ;;  %s687_s20 = sshll.u32 (%p49_p3), %s134_s18, 7 }
  0x10   : > { %s975_s23 = scalar_lea.vmem (%p49_p3), %s1101_s0, %s688_s19  ;;  %s136_s24 = scalar_lea.vmem (%p49_p3), [#allocation3], %s687_s20 }
  0x11   : > { %v199_v0 = vld [vmem:[%s975_s23] sm:$0xff] (%p49_p3)  ;;  %v201_v1 = vld [vmem:[%s975_s23 + $0x10] sm:$0xff] (%p49_p3) }
  0x12   : > { %v203_v2 = vld [vmem:[%s975_s23 + $0x20] sm:$0xff] (%p49_p3)  ;;  %200 = vst [vmem:[%s136_s24] sm:$0xff] (%p49_p3), %v199_v0  ;;  %202 = vst [vmem:[%s136_s24 + $0x8] sm:$0xff] (%p49_p3), %v201_v1  ;;  %v205_v3 = vld [vmem:[%s975_s23 + $0x30] sm:$0xff] (%p49_p3) }
  0x13   : > { %204 = vst [vmem:[%s136_s24 + $0x10] sm:$0xff] (%p49_p3), %v203_v2  ;;  %v207_v4 = vld [vmem:[%s975_s23 + $0x40] sm:$0xff] (%p49_p3)  ;;  %v209_v5 = vld [vmem:[%s975_s23 + $0x50] sm:$0xff] (%p49_p3)  ;;  %206 = vst [vmem:[%s136_s24 + $0x18] sm:$0xff] (%p49_p3), %v205_v3 }
  0x14   : > { %208 = vst [vmem:[%s136_s24 + $0x20] sm:$0xff] (%p49_p3), %v207_v4  ;;  %210 = vst [vmem:[%s136_s24 + $0x28] sm:$0xff] (%p49_p3), %v209_v5  ;;  %v211_v6 = vld [vmem:[%s975_s23 + $0x60] sm:$0xff] (%p49_p3)  ;;  %v213_v7 = vld [vmem:[%s975_s23 + $0x70] sm:$0xff] (%p49_p3) }
  0x15   : > { %v215_v8 = vld [vmem:[%s975_s23 + $0x80] sm:$0xff]  ;;  %212 = vst [vmem:[%s136_s24 + $0x30] sm:$0xff] %v211_v6  ;;  %214 = vst [vmem:[%s136_s24 + $0x38] sm:$0xff] %v213_v7  ;;  %v217_v9 = vld [vmem:[%s975_s23 + $0x90] sm:$0xff] }
  0x16   : > { %216 = vst [vmem:[%s136_s24 + $0x40] sm:$0xff] %v215_v8  ;;  %v219_v10 = vld [vmem:[%s975_s23 + $0xa0] sm:$0xff]  ;;  %v221_v11 = vld [vmem:[%s975_s23 + $0xb0] sm:$0xff]  ;;  %218 = vst [vmem:[%s136_s24 + $0x48] sm:$0xff] %v217_v9 }
  0x17   : > { %220 = vst [vmem:[%s136_s24 + $0x50] sm:$0xff] %v219_v10  ;;  %222 = vst [vmem:[%s136_s24 + $0x58] sm:$0xff] %v221_v11  ;;  %v223_v12 = vld [vmem:[%s975_s23 + $0xc0] sm:$0xff]  ;;  %v225_v13 = vld [vmem:[%s975_s23 + $0xd0] sm:$0xff] }
  0x18   : > { %v227_v14 = vld [vmem:[%s975_s23 + $0xe0] sm:$0xff]  ;;  %224 = vst [vmem:[%s136_s24 + $0x60] sm:$0xff] %v223_v12  ;;  %226 = vst [vmem:[%s136_s24 + $0x68] sm:$0xff] %v225_v13  ;;  %v229_v15 = vld [vmem:[%s975_s23 + $0xf0] sm:$0xff] }
  0x19   : > { %228 = vst [vmem:[%s136_s24 + $0x70] sm:$0xff] %v227_v14  ;;  %230 = vst [vmem:[%s136_s24 + $0x78] sm:$0xff] %v229_v15 }
  0x1a PF: > { %p689_p6 = scmp.ge.s32.totalorder %s914_s13, 1  ;;  %p247_p7 = scmp.lt.s32.totalorder %s914_s13, 3 }
  0x1c   : > { %p248_p8 = pnand %p689_p6, %p247_p7 }
  0x1d   : > { %s254_s25 = sand.u32 (!%p248_p8), 1, %s898_s9   ;;  %s691_s26 = sshll.u32 (!%p248_p8), %s906_s11, 4 }
  0x1e   : > { %251 = sbr.rel (%p248_p8) target bundleno = 319 (0x13f), region = 62  ;;  %s690_s27 = sshll.u32 (!%p248_p8), %s254_s25, 7 }
  0x1f   : > { %p288_p9 = scmp.lt.s32.totalorder (!%p248_p8), %s691_s26, 31  ;;  %s1002_s4 = scalar_lea.vmem (!%p248_p8), [#allocation3], %s690_s27 }
  0x20   : > { %p693_p10 = scmp.ne.s32.totalorder (!%p248_p8), %s906_s11, 0 }
  0x25   : > { %s1111_s26 = smov (!%p288_p9, %s691_s26), 31  ;;  %308 = sbr.rel (%p693_p10) target bundleno = 47 (0x2f), region = 70 }
  0x26   : > { %s692_s28 = sshll.u32 %s1111_s26, 3  ;;  %v916_v16 = vmov (!%p693_p10), 0.0  }
  0x27   : > { %s1000_s3 = scalar_lea.vmem %s1102_s1, %s692_s28  ;;  %309 = vst [vmem:[#allocation2] sm:$0xff] (!%p693_p10), %v916_v16  ;;  %310 = vst [vmem:[#allocation2 + $0x8] sm:$0xff] (!%p693_p10), %v916_v16 }
  0x28   : > { %311 = vst [vmem:[#allocation2 + $0x10] sm:$0xff] (!%p693_p10), %v916_v16  ;;  %312 = vst [vmem:[#allocation2 + $0x18] sm:$0xff] (!%p693_p10), %v916_v16 }
  0x29   : > { %313 = vst [vmem:[#allocation2 + $0x20] sm:$0xff] (!%p693_p10), %v916_v16  ;;  %314 = vst [vmem:[#allocation2 + $0x28] sm:$0xff] (!%p693_p10), %v916_v16 }
  0x2a   : > { %315 = vst [vmem:[#allocation2 + $0x30] sm:$0xff] (!%p693_p10), %v916_v16  ;;  %316 = vst [vmem:[#allocation2 + $0x38] sm:$0xff] (!%p693_p10), %v916_v16 }
  0x2b   : > { %317 = vst [vmem:[#allocation2 + $0x40] sm:$0xff] (!%p693_p10), %v916_v16  ;;  %318 = vst [vmem:[#allocation2 + $0x48] sm:$0xff] (!%p693_p10), %v916_v16 }
  0x2c   : > { %319 = vst [vmem:[#allocation2 + $0x50] sm:$0xff] %v916_v16  ;;  %320 = vst [vmem:[#allocation2 + $0x58] sm:$0xff] %v916_v16 }
  0x2d   : > { %321 = vst [vmem:[#allocation2 + $0x60] sm:$0xff] %v916_v16  ;;  %322 = vst [vmem:[#allocation2 + $0x68] sm:$0xff] %v916_v16 }
  0x2e   : > { %323 = vst [vmem:[#allocation2 + $0x70] sm:$0xff] %v916_v16  ;;  %324 = vst [vmem:[#allocation2 + $0x78] sm:$0xff] %v916_v16 }
  0x2f PF: > { %v357_v17 = vld [vmem:[%s1000_s3] sm:$0xff]  ;;  %v358_v18 = vld [vmem:[%s1000_s3 + $0x8] sm:$0xff]  ;;  %v359_v19 = vld [vmem:[%s1000_s3 + $0x10] sm:$0xff]  ;;  %p694_p11 = scmp.ne.s32.totalorder %s906_s11, 1 }
  0x30   : > { %v787_v20 = vpack.c.bf16 %v358_v18, %v357_v17  ;;  %v360_v21 = vld [vmem:[%s1000_s3 + $0x18] sm:$0xff]  ;;  %v361_v23 = vld [vmem:[%s1000_s3 + $0x20] sm:$0xff]  ;;  %v362_v24 = vld [vmem:[%s1000_s3 + $0x28] sm:$0xff] }
  0x31   : > { %v791_v22 = vpack.c.bf16 %v360_v21, %v359_v19  ;;  %v795_v25 = vpack.c.bf16 %v362_v24, %v361_v23  ;;  %v341_v26 = vld [vmem:[%s1002_s4] sm:$0xff]  ;;  %v363_v28 = vld [vmem:[%s1000_s3 + $0x30] sm:$0xff]  ;;  %v364_v29 = vld [vmem:[%s1000_s3 + $0x38] sm:$0xff] }
  0x32   : > { %788 = vmatprep.subr.bf16.mxu0 %v787_v20  ;;  %819 = vmatprep.subr.bf16.mxu1 %v787_v20  ;;  %v349_v27 = vld [vmem:[%s1002_s4 + $0x40] sm:$0xff]  ;;  %v799_v30 = vpack.c.bf16 %v364_v29, %v363_v28  ;;  %v366_v32 = vld [vmem:[%s1000_s3 + $0x48] sm:$0xff]  ;;  %v367_v34 = vld [vmem:[%s1000_s3 + $0x50] sm:$0xff] }
  0x33   : > { %790 = vmatpush3.bf16.msra.mxu0 %v787_v20  ;;  %827 = vmatpush3.bf16.msra.mxu1 %v787_v20  ;;  %v365_v31 = vld [vmem:[%s1000_s3 + $0x40] sm:$0xff]  ;;  %v368_v35 = vld [vmem:[%s1000_s3 + $0x58] sm:$0xff]  ;;  %v370_v38 = vld [vmem:[%s1000_s3 + $0x68] sm:$0xff] }
  0x34   : > { %792 = vmatprep.subr.bf16.mxu0 %v791_v22  ;;  %820 = vmatprep.subr.bf16.mxu1 %v791_v22  ;;  %v803_v33 = vpack.c.bf16 %v366_v32, %v365_v31  ;;  %v807_v36 = vpack.c.bf16 %v368_v35, %v367_v34  ;;  %v369_v37 = vld [vmem:[%s1000_s3 + $0x60] sm:$0xff]  ;;  %v371_v40 = vld [vmem:[%s1000_s3 + $0x70] sm:$0xff]  ;;  %v372_v41 = vld [vmem:[%s1000_s3 + $0x78] sm:$0xff] }
  0x35   : > { %763 = vmatprep.mubr.f32.mxu0 %v341_v26  ;;  %775 = vmatprep.mubr.f32.mxu1 %v349_v27  ;;  %v811_v39 = vpack.c.bf16 %v370_v38, %v369_v37  ;;  %v815_v42 = vpack.c.bf16 %v372_v41, %v371_v40  ;;  %v342_v43 = vld [vmem:[%s1002_s4 + $0x8] sm:$0xff]  ;;  %v343_v45 = vld [vmem:[%s1002_s4 + $0x10] sm:$0xff]  ;;  %v344_v47 = vld [vmem:[%s1002_s4 + $0x18] sm:$0xff] }
  0x36   : > { %v350_v44 = vld [vmem:[%s1002_s4 + $0x48] sm:$0xff]  ;;  %v351_v46 = vld [vmem:[%s1002_s4 + $0x50] sm:$0xff]  ;;  %v352_v48 = vld [vmem:[%s1002_s4 + $0x58] sm:$0xff] }
  0x37   : > { %794 = vmatpush3.bf16.msra.mxu0 %v791_v22  ;;  %828 = vmatpush3.bf16.msra.mxu1 %v791_v22  ;;  %v345_v49 = vld [vmem:[%s1002_s4 + $0x20] sm:$0xff]  ;;  %v346_v51 = vld [vmem:[%s1002_s4 + $0x28] sm:$0xff]  ;;  %v347_v53 = vld [vmem:[%s1002_s4 + $0x30] sm:$0xff] }
  0x38   : > { %796 = vmatprep.subr.bf16.mxu0 %v795_v25  ;;  %821 = vmatprep.subr.bf16.mxu1 %v795_v25  ;;  %v353_v50 = vld [vmem:[%s1002_s4 + $0x60] sm:$0xff]  ;;  %v354_v52 = vld [vmem:[%s1002_s4 + $0x68] sm:$0xff]  ;;  %v355_v54 = vld [vmem:[%s1002_s4 + $0x70] sm:$0xff] }
  0x39   : > { %v348_v55 = vld [vmem:[%s1002_s4 + $0x38] sm:$0xff]  ;;  %v326_v57 = vld [vmem:[#allocation2 + $0x8] sm:$0xff]  ;;  %v325_v59 = vld [vmem:[#allocation2] sm:$0xff] }
  0x3a   : > { %v356_v56 = vld [vmem:[%s1002_s4 + $0x78] sm:$0xff]  ;;  %v334_v58 = vld [vmem:[#allocation2 + $0x48] sm:$0xff]  ;;  %v333_v60 = vld [vmem:[#allocation2 + $0x40] sm:$0xff] }
  0x3b   : > { %798 = vmatpush3.bf16.msra.mxu0 %v795_v25  ;;  %829 = vmatpush3.bf16.msra.mxu1 %v795_v25  ;;  %v328_v5 = vld [vmem:[#allocation2 + $0x18] sm:$0xff]  ;;  %v327_v7 = vld [vmem:[#allocation2 + $0x10] sm:$0xff]  ;;  %v330_v17 = vld [vmem:[#allocation2 + $0x28] sm:$0xff] }
  0x3c   : > { %800 = vmatprep.subr.bf16.mxu0 %v799_v30  ;;  %822 = vmatprep.subr.bf16.mxu1 %v799_v30  ;;  %v336_v6 = vld [vmem:[#allocation2 + $0x58] sm:$0xff]  ;;  %v335_v8 = vld [vmem:[#allocation2 + $0x50] sm:$0xff]  ;;  %v338_v18 = vld [vmem:[#allocation2 + $0x68] sm:$0xff] }
  0x3d   : > { %v329_v19 = vld [vmem:[#allocation2 + $0x20] sm:$0xff]  ;;  %v332_v29 = vld [vmem:[#allocation2 + $0x38] sm:$0xff]  ;;  %v331_v31 = vld [vmem:[#allocation2 + $0x30] sm:$0xff] }
  0x3e   : > { %v337_v20 = vld [vmem:[#allocation2 + $0x60] sm:$0xff]  ;;  %v339_v32 = vld [vmem:[#allocation2 + $0x70] sm:$0xff] }
  0x3f   : > { %802 = vmatpush3.bf16.msra.mxu0 %v799_v30  ;;  %830 = vmatpush3.bf16.msra.mxu1 %v799_v30  ;;  %v340_v30 = vld [vmem:[#allocation2 + $0x78] sm:$0xff] }
  0x40   : > { %804 = vmatprep.subr.bf16.mxu0 %v803_v33  ;;  %823 = vmatprep.subr.bf16.mxu1 %v803_v33 }
  0x43   : > { %806 = vmatpush3.bf16.msra.mxu0 %v803_v33  ;;  %831 = vmatpush3.bf16.msra.mxu1 %v803_v33 }
  0x44   : > { %808 = vmatprep.subr.bf16.mxu0 %v807_v36  ;;  %824 = vmatprep.subr.bf16.mxu1 %v807_v36 }
  0x47   : > { %810 = vmatpush3.bf16.msra.mxu0 %v807_v36  ;;  %832 = vmatpush3.bf16.msra.mxu1 %v807_v36 }
  0x48   : > { %812 = vmatprep.subr.bf16.mxu0 %v811_v39  ;;  %825 = vmatprep.subr.bf16.mxu1 %v811_v39 }
  0x4b   : > { %814 = vmatpush3.bf16.msra.mxu0 %v811_v39  ;;  %833 = vmatpush3.bf16.msra.mxu1 %v811_v39 }
  0x4c   : > { %816 = vmatprep.subr.bf16.mxu0 %v815_v42  ;;  %826 = vmatprep.subr.bf16.mxu1 %v815_v42 }
  0x4f   : > { %818 = vmatpush3.bf16.msra.mxu0 %v815_v42  ;;  %834 = vmatpush3.bf16.msra.mxu1 %v815_v42 }
  0x52   : > { %764 = vmatmul.mubr.f32.vlgmr.msra.gmra.mrb[0].mxu0 %v342_v43  ;;  %776 = vmatmul.mubr.f32.vlgmr.msra.gmra.mrb[0].mxu1 %v350_v44 }
  0x53   : > { %766 = vmatprep.mubr.f32.mxu0 %v343_v45  ;;  %778 = vmatprep.mubr.f32.mxu1 %v351_v46 }
  0x56   : > { %767 = vmatmul.mubr.f32.gmra.mrb[2].mxu0 %v344_v47  ;;  %779 = vmatmul.mubr.f32.gmra.mrb[2].mxu1 %v352_v48 }
  0x57   : > { %769 = vmatprep.mubr.f32.mxu0 %v345_v49  ;;  %781 = vmatprep.mubr.f32.mxu1 %v353_v50 }
  0x5a   : > { %770 = vmatmul.mubr.f32.gmra.mrb[4].mxu0 %v346_v51  ;;  %782 = vmatmul.mubr.f32.gmra.mrb[4].mxu1 %v354_v52 }
  0x5b   : > { %772 = vmatprep.mubr.f32.mxu0 %v347_v53  ;;  %784 = vmatprep.mubr.f32.mxu1 %v355_v54 }
  0x5e   : > { %773 = vmatmul.mubr.f32.gmra.mrb[6].mxu0 %v348_v55  ;;  %785 = vmatmul.mubr.f32.gmra.mrb[6].mxu1 %v356_v56 }
 0x125   : > { %v765_v61 = vpop.f32.mrb[0].mxu0  ;;  %v777_v62 = vpop.f32.mrb[0].mxu1 }
 0x126   : > { %v519_v63 = vadd.f32 %v765_v61, %v326_v57  ;;  %v527_v0 = vadd.f32 %v777_v62, %v334_v58  ;;  %v439_v1 = vpop.f32.mrb[1].mxu0  ;;  %v479_v2 = vpop.f32.mrb[1].mxu1 }
 0x127   : > { %v518_v3 = vadd.f32 %v439_v1, %v325_v59  ;;  %v526_v4 = vadd.f32 %v479_v2, %v333_v60 }
 0x128   : > { %535 = vst [vmem:[#allocation2 + $0x8] sm:$0xff] %v519_v63  ;;  %543 = vst [vmem:[#allocation2 + $0x48] sm:$0xff] %v527_v0 }
 0x129   : > { %534 = vst [vmem:[#allocation2] sm:$0xff] %v518_v3  ;;  %542 = vst [vmem:[#allocation2 + $0x40] sm:$0xff] %v526_v4  ;;  %v768_v9 = vpop.f32.mrb[2].mxu0  ;;  %v780_v10 = vpop.f32.mrb[2].mxu1 }
 0x12a   : > { %v521_v11 = vadd.f32 %v768_v9, %v328_v5  ;;  %v529_v12 = vadd.f32 %v780_v10, %v336_v6  ;;  %v449_v13 = vpop.f32.mrb[3].mxu0  ;;  %v489_v14 = vpop.f32.mrb[3].mxu1 }
 0x12b   : > { %v520_v15 = vadd.f32 %v449_v13, %v327_v7  ;;  %v528_v16 = vadd.f32 %v489_v14, %v335_v8 }
 0x12c   : > { %537 = vst [vmem:[#allocation2 + $0x18] sm:$0xff] %v521_v11  ;;  %545 = vst [vmem:[#allocation2 + $0x58] sm:$0xff] %v529_v12 }
 0x12d   : > { %536 = vst [vmem:[#allocation2 + $0x10] sm:$0xff] %v520_v15  ;;  %544 = vst [vmem:[#allocation2 + $0x50] sm:$0xff] %v528_v16  ;;  %v771_v21 = vpop.f32.mrb[4].mxu0  ;;  %v783_v22 = vpop.f32.mrb[4].mxu1 }
 0x12e   : > { %v523_v23 = vadd.f32 %v771_v21, %v330_v17  ;;  %v531_v24 = vadd.f32 %v783_v22, %v338_v18  ;;  %v459_v25 = vpop.f32.mrb[5].mxu0  ;;  %v499_v26 = vpop.f32.mrb[5].mxu1 }
 0x12f   : > { %v522_v27 = vadd.f32 %v459_v25, %v329_v19  ;;  %v530_v28 = vadd.f32 %v499_v26, %v337_v20  ;;  %553 = sbr.rel (%p694_p11) target bundleno = 319 (0x13f), region = 74  ;;  %v555_v42 = vld [vmem:[#allocation2 + $0x8] sm:$0xff] (!%p694_p11) }
 0x130   : > { %539 = vst [vmem:[#allocation2 + $0x28] sm:$0xff] %v523_v23  ;;  %547 = vst [vmem:[#allocation2 + $0x68] sm:$0xff] %v531_v24  ;;  %v554_v41 = vld [vmem:[#allocation2] sm:$0xff] (!%p694_p11)  ;;  %v563_v50 = vld [vmem:[#allocation2 + $0x48] sm:$0xff] (!%p694_p11) }
 0x131   : > { %538 = vst [vmem:[#allocation2 + $0x20] sm:$0xff] %v522_v27  ;;  %546 = vst [vmem:[#allocation2 + $0x60] sm:$0xff] %v530_v28  ;;  %v774_v33 = vpop.f32.mrb[6].mxu0  ;;  %v786_v34 = vpop.f32.mrb[6].mxu1  ;;  %v562_v49 = vld [vmem:[#allocation2 + $0x40] sm:$0xff] (!%p694_p11) }
 0x132   : > { %v525_v35 = vadd.f32 %v774_v33, %v332_v29  ;;  %v533_v36 = vadd.f32 %v786_v34, %v340_v30  ;;  %v469_v37 = vpop.f32.mrb[7].mxu0  ;;  %v509_v38 = vpop.f32.mrb[7].mxu1  ;;  %570 = vst [vmem:[%s1103_s2] sm:$0xff] (!%p694_p11), %v554_v41  ;;  %571 = vst [vmem:[%s1103_s2 + $0x8] sm:$0xff] (!%p694_p11), %v555_v42 }
 0x133   : > { %v524_v39 = vadd.f32 %v469_v37, %v331_v31  ;;  %v532_v40 = vadd.f32 %v509_v38, %v339_v32  ;;  %v557_v44 = vld [vmem:[#allocation2 + $0x18] sm:$0xff] (!%p694_p11)  ;;  %578 = vst [vmem:[%s1103_s2 + $0x40] sm:$0xff] (!%p694_p11), %v562_v49  ;;  %579 = vst [vmem:[%s1103_s2 + $0x48] sm:$0xff] (!%p694_p11), %v563_v50 }
 0x134   : > { %541 = vst [vmem:[#allocation2 + $0x38] sm:$0xff] %v525_v35  ;;  %549 = vst [vmem:[#allocation2 + $0x78] sm:$0xff] %v533_v36  ;;  %v556_v43 = vld [vmem:[#allocation2 + $0x10] sm:$0xff] (!%p694_p11)  ;;  %v565_v52 = vld [vmem:[#allocation2 + $0x58] sm:$0xff] (!%p694_p11) }
 0x135   : > { %540 = vst [vmem:[#allocation2 + $0x30] sm:$0xff] %v524_v39  ;;  %548 = vst [vmem:[#allocation2 + $0x70] sm:$0xff] %v532_v40  ;;  %v564_v51 = vld [vmem:[#allocation2 + $0x50] sm:$0xff] (!%p694_p11) }
 0x136   : > { %572 = vst [vmem:[%s1103_s2 + $0x10] sm:$0xff] %v556_v43  ;;  %573 = vst [vmem:[%s1103_s2 + $0x18] sm:$0xff] %v557_v44 }
 0x137   : > { %v559_v46 = vld [vmem:[#allocation2 + $0x28] sm:$0xff]  ;;  %580 = vst [vmem:[%s1103_s2 + $0x50] sm:$0xff] %v564_v51  ;;  %581 = vst [vmem:[%s1103_s2 + $0x58] sm:$0xff] %v565_v52 }
 0x138   : > { %v558_v45 = vld [vmem:[#allocation2 + $0x20] sm:$0xff]  ;;  %575 = vst [vmem:[%s1103_s2 + $0x28] sm:$0xff] %v559_v46  ;;  %v567_v54 = vld [vmem:[#allocation2 + $0x68] sm:$0xff] }
 0x139   : > { %574 = vst [vmem:[%s1103_s2 + $0x20] sm:$0xff] %v558_v45  ;;  %v566_v53 = vld [vmem:[#allocation2 + $0x60] sm:$0xff]  ;;  %583 = vst [vmem:[%s1103_s2 + $0x68] sm:$0xff] %v567_v54 }
 0x13a   : > { %582 = vst [vmem:[%s1103_s2 + $0x60] sm:$0xff] %v566_v53 }
 0x13b   : > { %v561_v48 = vld [vmem:[#allocation2 + $0x38] sm:$0xff] }
 0x13c   : > { %v560_v47 = vld [vmem:[#allocation2 + $0x30] sm:$0xff]  ;;  %577 = vst [vmem:[%s1103_s2 + $0x38] sm:$0xff] %v561_v48  ;;  %v569_v56 = vld [vmem:[#allocation2 + $0x78] sm:$0xff] }
 0x13d   : > { %576 = vst [vmem:[%s1103_s2 + $0x30] sm:$0xff] %v560_v47  ;;  %v568_v55 = vld [vmem:[#allocation2 + $0x70] sm:$0xff]  ;;  %585 = vst [vmem:[%s1103_s2 + $0x78] sm:$0xff] %v569_v56 }
 0x13e   : > { %584 = vst [vmem:[%s1103_s2 + $0x70] sm:$0xff] %v568_v55 }
 0x13f PF: > { %s12_s13 = sadd.s32 1, %s914_s13   ;;  %s1104_s9 = smov %s902_s10 }
 0x140   : > { %p9_p12 = scmp.ge.s32.totalorder %s12_s13, 4   ;;  %s1105_s10 = smov %s967_s17 }
 0x141   : > { %s1106_s11 = smov %s910_s12  ;;  %s1107_s12 = smov %s1109_s14 }
 0x142   :  { %11 = sbr.rel (!%p9_p12) target bundleno = 3 (0x3), region = 112 }

// kernel: napgcn_forward.16
= control target key start
LH: loop header
LB: loop body
LE: loop exit
PB: predicated region body
PF: predicated region fallthrough
CT: control target
= control target key end

     0   :  { %s590_s1 = inlined_call_operand.vmem [shape: f32[128,128], index: 1, kind: input, shape index: {}]   ;;  %s591_s0 = inlined_call_operand.vmem [shape: f32[128,128], index: 0, kind: input, shape index: {}]   ;;  %s592_s2 = inlined_call_operand.vmem [shape: f32[128,128], index: 2, kind: output, shape index: {}]  }
   0x1   :  { %v63_v0 = vld [vmem:[%s590_s1] sm:$0xff]  ;;  %v64_v1 = vld [vmem:[%s590_s1 + $0x8] sm:$0xff]  ;;  %v65_v2 = vld [vmem:[%s590_s1 + $0x10] sm:$0xff] }
   0x2   :  { %v383_v3 = vpack.c.bf16 %v64_v1, %v63_v0  ;;  %v66_v4 = vld [vmem:[%s590_s1 + $0x18] sm:$0xff]  ;;  %v67_v6 = vld [vmem:[%s590_s1 + $0x20] sm:$0xff]  ;;  %v68_v7 = vld [vmem:[%s590_s1 + $0x28] sm:$0xff] }
   0x3   :  { %v387_v5 = vpack.c.bf16 %v66_v4, %v65_v2  ;;  %v391_v8 = vpack.c.bf16 %v68_v7, %v67_v6  ;;  %v47_v9 = vld [vmem:[%s591_s0] sm:$0xff]  ;;  %v69_v11 = vld [vmem:[%s590_s1 + $0x30] sm:$0xff]  ;;  %v70_v12 = vld [vmem:[%s590_s1 + $0x38] sm:$0xff] }
   0x4   :  { %384 = vmatprep.subr.bf16.mxu0 %v383_v3  ;;  %415 = vmatprep.subr.bf16.mxu1 %v383_v3  ;;  %v55_v10 = vld [vmem:[%s591_s0 + $0x40] sm:$0xff]  ;;  %v395_v13 = vpack.c.bf16 %v70_v12, %v69_v11  ;;  %v72_v15 = vld [vmem:[%s590_s1 + $0x48] sm:$0xff]  ;;  %v73_v17 = vld [vmem:[%s590_s1 + $0x50] sm:$0xff] }
   0x5   :  { %386 = vmatpush3.bf16.msra.mxu0 %v383_v3  ;;  %423 = vmatpush3.bf16.msra.mxu1 %v383_v3  ;;  %v71_v14 = vld [vmem:[%s590_s1 + $0x40] sm:$0xff]  ;;  %v74_v18 = vld [vmem:[%s590_s1 + $0x58] sm:$0xff]  ;;  %v76_v21 = vld [vmem:[%s590_s1 + $0x68] sm:$0xff] }
   0x6   :  { %388 = vmatprep.subr.bf16.mxu0 %v387_v5  ;;  %416 = vmatprep.subr.bf16.mxu1 %v387_v5  ;;  %v399_v16 = vpack.c.bf16 %v72_v15, %v71_v14  ;;  %v403_v19 = vpack.c.bf16 %v74_v18, %v73_v17  ;;  %v75_v20 = vld [vmem:[%s590_s1 + $0x60] sm:$0xff]  ;;  %v77_v23 = vld [vmem:[%s590_s1 + $0x70] sm:$0xff]  ;;  %v78_v24 = vld [vmem:[%s590_s1 + $0x78] sm:$0xff] }
   0x7   :  { %359 = vmatprep.mubr.f32.mxu0 %v47_v9  ;;  %371 = vmatprep.mubr.f32.mxu1 %v55_v10  ;;  %v407_v22 = vpack.c.bf16 %v76_v21, %v75_v20  ;;  %v411_v25 = vpack.c.bf16 %v78_v24, %v77_v23  ;;  %v48_v26 = vld [vmem:[%s591_s0 + $0x8] sm:$0xff]  ;;  %v49_v28 = vld [vmem:[%s591_s0 + $0x10] sm:$0xff]  ;;  %v50_v30 = vld [vmem:[%s591_s0 + $0x18] sm:$0xff] }
   0x8   :  { %v56_v27 = vld [vmem:[%s591_s0 + $0x48] sm:$0xff]  ;;  %v57_v29 = vld [vmem:[%s591_s0 + $0x50] sm:$0xff]  ;;  %v58_v31 = vld [vmem:[%s591_s0 + $0x58] sm:$0xff] }
   0x9   :  { %390 = vmatpush3.bf16.msra.mxu0 %v387_v5  ;;  %424 = vmatpush3.bf16.msra.mxu1 %v387_v5  ;;  %v51_v32 = vld [vmem:[%s591_s0 + $0x20] sm:$0xff]  ;;  %v52_v34 = vld [vmem:[%s591_s0 + $0x28] sm:$0xff]  ;;  %v53_v36 = vld [vmem:[%s591_s0 + $0x30] sm:$0xff] }
   0xa   :  { %392 = vmatprep.subr.bf16.mxu0 %v391_v8  ;;  %417 = vmatprep.subr.bf16.mxu1 %v391_v8  ;;  %v59_v33 = vld [vmem:[%s591_s0 + $0x60] sm:$0xff]  ;;  %v60_v35 = vld [vmem:[%s591_s0 + $0x68] sm:$0xff]  ;;  %v61_v37 = vld [vmem:[%s591_s0 + $0x70] sm:$0xff] }
   0xb   :  { %v54_v38 = vld [vmem:[%s591_s0 + $0x38] sm:$0xff] }
   0xc   :  { %v62_v39 = vld [vmem:[%s591_s0 + $0x78] sm:$0xff] }
   0xd   :  { %394 = vmatpush3.bf16.msra.mxu0 %v391_v8  ;;  %425 = vmatpush3.bf16.msra.mxu1 %v391_v8 }
   0xe   :  { %396 = vmatprep.subr.bf16.mxu0 %v395_v13  ;;  %418 = vmatprep.subr.bf16.mxu1 %v395_v13 }
  0x11   :  { %398 = vmatpush3.bf16.msra.mxu0 %v395_v13  ;;  %426 = vmatpush3.bf16.msra.mxu1 %v395_v13 }
  0x12   :  { %400 = vmatprep.subr.bf16.mxu0 %v399_v16  ;;  %419 = vmatprep.subr.bf16.mxu1 %v399_v16 }
  0x15   :  { %402 = vmatpush3.bf16.msra.mxu0 %v399_v16  ;;  %427 = vmatpush3.bf16.msra.mxu1 %v399_v16 }
  0x16   :  { %404 = vmatprep.subr.bf16.mxu0 %v403_v19  ;;  %420 = vmatprep.subr.bf16.mxu1 %v403_v19 }
  0x19   :  { %406 = vmatpush3.bf16.msra.mxu0 %v403_v19  ;;  %428 = vmatpush3.bf16.msra.mxu1 %v403_v19 }
  0x1a   :  { %408 = vmatprep.subr.bf16.mxu0 %v407_v22  ;;  %421 = vmatprep.subr.bf16.mxu1 %v407_v22 }
  0x1d   :  { %410 = vmatpush3.bf16.msra.mxu0 %v407_v22  ;;  %429 = vmatpush3.bf16.msra.mxu1 %v407_v22 }
  0x1e   :  { %412 = vmatprep.subr.bf16.mxu0 %v411_v25  ;;  %422 = vmatprep.subr.bf16.mxu1 %v411_v25 }
  0x21   :  { %414 = vmatpush3.bf16.msra.mxu0 %v411_v25  ;;  %430 = vmatpush3.bf16.msra.mxu1 %v411_v25 }
  0x24   :  { %360 = vmatmul.mubr.f32.vlgmr.msra.gmra.mrb[0].mxu0 %v48_v26  ;;  %372 = vmatmul.mubr.f32.vlgmr.msra.gmra.mrb[0].mxu1 %v56_v27 }
  0x25   :  { %362 = vmatprep.mubr.f32.mxu0 %v49_v28  ;;  %374 = vmatprep.mubr.f32.mxu1 %v57_v29 }
  0x28   :  { %363 = vmatmul.mubr.f32.gmra.mrb[2].mxu0 %v50_v30  ;;  %375 = vmatmul.mubr.f32.gmra.mrb[2].mxu1 %v58_v31 }
  0x29   :  { %365 = vmatprep.mubr.f32.mxu0 %v51_v32  ;;  %377 = vmatprep.mubr.f32.mxu1 %v59_v33 }
  0x2c   :  { %366 = vmatmul.mubr.f32.gmra.mrb[4].mxu0 %v52_v34  ;;  %378 = vmatmul.mubr.f32.gmra.mrb[4].mxu1 %v60_v35 }
  0x2d   :  { %368 = vmatprep.mubr.f32.mxu0 %v53_v36  ;;  %380 = vmatprep.mubr.f32.mxu1 %v61_v37 }
  0x30   :  { %369 = vmatmul.mubr.f32.gmra.mrb[6].mxu0 %v54_v38  ;;  %381 = vmatmul.mubr.f32.gmra.mrb[6].mxu1 %v62_v39 }
  0xf7   :  { %v361_v40 = vpop.f32.mrb[0].mxu0  ;;  %v373_v41 = vpop.f32.mrb[0].mxu1 }
  0xf8   :  { %276 = vst [vmem:[%s592_s2 + $0x8] sm:$0xff] %v361_v40  ;;  %284 = vst [vmem:[%s592_s2 + $0x48] sm:$0xff] %v373_v41  ;;  %v145_v42 = vpop.f32.mrb[1].mxu0  ;;  %v185_v43 = vpop.f32.mrb[1].mxu1 }
  0xf9   :  { %275 = vst [vmem:[%s592_s2] sm:$0xff] %v145_v42  ;;  %283 = vst [vmem:[%s592_s2 + $0x40] sm:$0xff] %v185_v43 }
  0xfb   :  { %v364_v44 = vpop.f32.mrb[2].mxu0  ;;  %v376_v45 = vpop.f32.mrb[2].mxu1 }
  0xfc   :  { %278 = vst [vmem:[%s592_s2 + $0x18] sm:$0xff] %v364_v44  ;;  %286 = vst [vmem:[%s592_s2 + $0x58] sm:$0xff] %v376_v45  ;;  %v155_v46 = vpop.f32.mrb[3].mxu0  ;;  %v195_v47 = vpop.f32.mrb[3].mxu1 }
  0xfd   :  { %277 = vst [vmem:[%s592_s2 + $0x10] sm:$0xff] %v155_v46  ;;  %285 = vst [vmem:[%s592_s2 + $0x50] sm:$0xff] %v195_v47 }
  0xff   :  { %v367_v48 = vpop.f32.mrb[4].mxu0  ;;  %v379_v49 = vpop.f32.mrb[4].mxu1 }
 0x100   :  { %280 = vst [vmem:[%s592_s2 + $0x28] sm:$0xff] %v367_v48  ;;  %288 = vst [vmem:[%s592_s2 + $0x68] sm:$0xff] %v379_v49  ;;  %v165_v50 = vpop.f32.mrb[5].mxu0  ;;  %v205_v51 = vpop.f32.mrb[5].mxu1 }
 0x101   :  { %279 = vst [vmem:[%s592_s2 + $0x20] sm:$0xff] %v165_v50  ;;  %287 = vst [vmem:[%s592_s2 + $0x60] sm:$0xff] %v205_v51 }
 0x103   :  { %v370_v52 = vpop.f32.mrb[6].mxu0  ;;  %v382_v53 = vpop.f32.mrb[6].mxu1 }
 0x104   :  { %282 = vst [vmem:[%s592_s2 + $0x38] sm:$0xff] %v370_v52  ;;  %290 = vst [vmem:[%s592_s2 + $0x78] sm:$0xff] %v382_v53  ;;  %v175_v54 = vpop.f32.mrb[7].mxu0  ;;  %v215_v55 = vpop.f32.mrb[7].mxu1 }
 0x105   :  { %281 = vst [vmem:[%s592_s2 + $0x30] sm:$0xff] %v175_v54  ;;  %289 = vst [vmem:[%s592_s2 + $0x70] sm:$0xff] %v215_v55 }

// kernel: napgcn_forward.15
= control target key start
LH: loop header
LB: loop body
LE: loop exit
PB: predicated region body
PF: predicated region fallthrough
CT: control target
= control target key end

     0   :  { %v619_v3 = vmov 0   ;;  %s903_s1 = inlined_call_operand.vmem [shape: f32[128,128], index: 1, kind: input, shape index: {}]   ;;  %s904_s0 = inlined_call_operand.vmem [shape: f32[128,128], index: 0, kind: input, shape index: {}]   ;;  %s905_s2 = inlined_call_operand.vmem [shape: f32[128,1], index: 2, kind: input, shape index: {}]   ;;  %s906_s3 = inlined_call_operand.vmem [shape: f32[128,128], index: 3, kind: output, shape index: {0}]   ;;  %s907_s4 = inlined_call_operand.vmem [shape: f32[128,128], index: 4, kind: output, shape index: {1}]  }
   0x1   :  { %v68_v0 = vld [vmem:[%s903_s1] sm:$0xff]  ;;  %v69_v1 = vld [vmem:[%s903_s1 + $0x8] sm:$0xff]  ;;  %v70_v2 = vld [vmem:[%s903_s1 + $0x10] sm:$0xff]  ;;  %618 = vset.pattern.permute.xlu1 %v619_v3  ;;  %617 = vset.pattern.permute.xlu0 %v619_v3 }
   0x2   :  { %v568_v4 = vpack.c.bf16 %v69_v1, %v68_v0  ;;  %v71_v5 = vld [vmem:[%s903_s1 + $0x18] sm:$0xff]  ;;  %v72_v7 = vld [vmem:[%s903_s1 + $0x20] sm:$0xff]  ;;  %v73_v8 = vld [vmem:[%s903_s1 + $0x28] sm:$0xff] }
   0x3   :  { %v572_v6 = vpack.c.bf16 %v71_v5, %v70_v2  ;;  %v576_v9 = vpack.c.bf16 %v73_v8, %v72_v7  ;;  %v52_v10 = vld [vmem:[%s904_s0] sm:$0xff]  ;;  %v74_v12 = vld [vmem:[%s903_s1 + $0x30] sm:$0xff]  ;;  %v75_v13 = vld [vmem:[%s903_s1 + $0x38] sm:$0xff] }
   0x4   :  { %569 = vmatprep.subr.bf16.mxu0 %v568_v4  ;;  %600 = vmatprep.subr.bf16.mxu1 %v568_v4  ;;  %v60_v11 = vld [vmem:[%s904_s0 + $0x40] sm:$0xff]  ;;  %v580_v14 = vpack.c.bf16 %v75_v13, %v74_v12  ;;  %v77_v16 = vld [vmem:[%s903_s1 + $0x48] sm:$0xff]  ;;  %v346_v17 = vld [vmem:[%s905_s2 + $0x10] sm:$0xff] }
   0x5   :  { %571 = vmatpush3.bf16.msra.mxu0 %v568_v4  ;;  %608 = vmatpush3.bf16.msra.mxu1 %v568_v4  ;;  %v76_v15 = vld [vmem:[%s903_s1 + $0x40] sm:$0xff]  ;;  %v347_v19 = vld [vmem:[%s905_s2 + $0x18] sm:$0xff]  ;;  %v78_v21 = vld [vmem:[%s903_s1 + $0x50] sm:$0xff] }
   0x6   :  { %573 = vmatprep.subr.bf16.mxu0 %v572_v6  ;;  %601 = vmatprep.subr.bf16.mxu1 %v572_v6  ;;  %v344_v18 = vld [vmem:[%s905_s2] sm:$0xff]  ;;  %v584_v20 = vpack.c.bf16 %v77_v16, %v76_v15  ;;  %v79_v22 = vld [vmem:[%s903_s1 + $0x58] sm:$0xff]  ;;  %v345_v23 = vld [vmem:[%s905_s2 + $0x8] sm:$0xff] }
   0x7   :  { %544 = vmatprep.mubr.f32.mxu0 %v52_v10  ;;  %556 = vmatprep.mubr.f32.mxu1 %v60_v11  ;;  %v349_v24 = vld [vmem:[%s905_s2 + $0x28] sm:$0xff]  ;;  %v588_v25 = vpack.c.bf16 %v79_v22, %v78_v21  ;;  %v80_v26 = vld [vmem:[%s903_s1 + $0x60] sm:$0xff]  ;;  %v351_v29 = vld [vmem:[%s905_s2 + $0x38] sm:$0xff] }
   0x8   :  { %372 = vperm.xlu1 %618, %v346_v17   ;;  %362 = vperm.xlu0 %617, %v344_v18   ;;  %v81_v27 = vld [vmem:[%s903_s1 + $0x68] sm:$0xff]  ;;  %v348_v28 = vld [vmem:[%s905_s2 + $0x20] sm:$0xff]  ;;  %v82_v31 = vld [vmem:[%s903_s1 + $0x70] sm:$0xff] }
   0x9   :  { %575 = vmatpush3.bf16.msra.mxu0 %v572_v6  ;;  %609 = vmatpush3.bf16.msra.mxu1 %v572_v6  ;;  %v592_v30 = vpack.c.bf16 %v81_v27, %v80_v26  ;;  %v83_v32 = vld [vmem:[%s903_s1 + $0x78] sm:$0xff]  ;;  %v350_v33 = vld [vmem:[%s905_s2 + $0x30] sm:$0xff]  ;;  %v353_v34 = vld [vmem:[%s905_s2 + $0x48] sm:$0xff] }
   0xa   :  { %577 = vmatprep.subr.bf16.mxu0 %v576_v9  ;;  %602 = vmatprep.subr.bf16.mxu1 %v576_v9  ;;  %v596_v35 = vpack.c.bf16 %v83_v32, %v82_v31  ;;  %v352_v36 = vld [vmem:[%s905_s2 + $0x40] sm:$0xff]  ;;  %v355_v37 = vld [vmem:[%s905_s2 + $0x58] sm:$0xff]  ;;  %v354_v38 = vld [vmem:[%s905_s2 + $0x50] sm:$0xff] }
   0xb   :  { %v53_v39 = vld [vmem:[%s904_s0 + $0x8] sm:$0xff]  ;;  %v54_v41 = vld [vmem:[%s904_s0 + $0x10] sm:$0xff]  ;;  %v356_v44 = vld [vmem:[%s905_s2 + $0x60] sm:$0xff] }
   0xc   :  { %377 = vperm.xlu1 %618, %v347_v19   ;;  %367 = vperm.xlu0 %617, %v345_v23   ;;  %v61_v40 = vld [vmem:[%s904_s0 + $0x48] sm:$0xff]  ;;  %v62_v42 = vld [vmem:[%s904_s0 + $0x50] sm:$0xff]  ;;  %v55_v45 = vld [vmem:[%s904_s0 + $0x18] sm:$0xff] }
   0xd   :  { %579 = vmatpush3.bf16.msra.mxu0 %v576_v9  ;;  %610 = vmatpush3.bf16.msra.mxu1 %v576_v9  ;;  %v357_v43 = vld [vmem:[%s905_s2 + $0x68] sm:$0xff]  ;;  %v63_v46 = vld [vmem:[%s904_s0 + $0x58] sm:$0xff]  ;;  %v56_v47 = vld [vmem:[%s904_s0 + $0x20] sm:$0xff] }
   0xe   :  { %581 = vmatprep.subr.bf16.mxu0 %v580_v14  ;;  %603 = vmatprep.subr.bf16.mxu1 %v580_v14  ;;  %v64_v48 = vld [vmem:[%s904_s0 + $0x60] sm:$0xff]  ;;  %v359_v49 = vld [vmem:[%s905_s2 + $0x78] sm:$0xff]  ;;  %v358_v50 = vld [vmem:[%s905_s2 + $0x70] sm:$0xff] }
   0xf   :  { %v57_v51 = vld [vmem:[%s904_s0 + $0x28] sm:$0xff]  ;;  %v58_v53 = vld [vmem:[%s904_s0 + $0x30] sm:$0xff]  ;;  %v59_v55 = vld [vmem:[%s904_s0 + $0x38] sm:$0xff] }
  0x10   :  { %387 = vperm.xlu1 %618, %v349_v24   ;;  %382 = vperm.xlu0 %617, %v348_v28   ;;  %v65_v52 = vld [vmem:[%s904_s0 + $0x68] sm:$0xff]  ;;  %v66_v54 = vld [vmem:[%s904_s0 + $0x70] sm:$0xff]  ;;  %v67_v56 = vld [vmem:[%s904_s0 + $0x78] sm:$0xff] }
  0x11   :  { %583 = vmatpush3.bf16.msra.mxu0 %v580_v14  ;;  %611 = vmatpush3.bf16.msra.mxu1 %v580_v14 }
  0x12   :  { %585 = vmatprep.subr.bf16.mxu0 %v584_v20  ;;  %604 = vmatprep.subr.bf16.mxu1 %v584_v20 }
  0x14   :  { %397 = vperm.xlu1 %618, %v351_v29   ;;  %392 = vperm.xlu0 %617, %v350_v33  }
  0x15   :  { %587 = vmatpush3.bf16.msra.mxu0 %v584_v20  ;;  %612 = vmatpush3.bf16.msra.mxu1 %v584_v20 }
  0x16   :  { %589 = vmatprep.subr.bf16.mxu0 %v588_v25  ;;  %605 = vmatprep.subr.bf16.mxu1 %v588_v25 }
  0x18   :  { %407 = vperm.xlu1 %618, %v353_v34   ;;  %402 = vperm.xlu0 %617, %v352_v36  }
  0x19   :  { %591 = vmatpush3.bf16.msra.mxu0 %v588_v25  ;;  %613 = vmatpush3.bf16.msra.mxu1 %v588_v25 }
  0x1a   :  { %593 = vmatprep.subr.bf16.mxu0 %v592_v30  ;;  %606 = vmatprep.subr.bf16.mxu1 %v592_v30 }
  0x1c   :  { %417 = vperm.xlu1 %618, %v355_v37   ;;  %412 = vperm.xlu0 %617, %v354_v38  }
  0x1d   :  { %595 = vmatpush3.bf16.msra.mxu0 %v592_v30  ;;  %614 = vmatpush3.bf16.msra.mxu1 %v592_v30 }
  0x1e   :  { %597 = vmatprep.subr.bf16.mxu0 %v596_v35  ;;  %607 = vmatprep.subr.bf16.mxu1 %v596_v35 }
  0x20   :  { %427 = vperm.xlu1 %618, %v357_v43   ;;  %422 = vperm.xlu0 %617, %v356_v44  }
  0x21   :  { %599 = vmatpush3.bf16.msra.mxu0 %v596_v35  ;;  %615 = vmatpush3.bf16.msra.mxu1 %v596_v35 }
  0x24   :  { %545 = vmatmul.mubr.f32.vlgmr.msra.gmra.mrb[0].mxu0 %v53_v39  ;;  %557 = vmatmul.mubr.f32.vlgmr.msra.gmra.mrb[0].mxu1 %v61_v40 }
  0x25   :  { %547 = vmatprep.mubr.f32.mxu0 %v54_v41  ;;  %559 = vmatprep.mubr.f32.mxu1 %v62_v42 }
  0x26   :  { %437 = vperm.xlu1 %618, %v359_v49   ;;  %432 = vperm.xlu0 %617, %v358_v50  }
  0x28   :  { %548 = vmatmul.mubr.f32.gmra.mrb[2].mxu0 %v55_v45  ;;  %560 = vmatmul.mubr.f32.gmra.mrb[2].mxu1 %v63_v46 }
  0x29   :  { %550 = vmatprep.mubr.f32.mxu0 %v56_v47  ;;  %562 = vmatprep.mubr.f32.mxu1 %v64_v48 }
  0x2c   :  { %551 = vmatmul.mubr.f32.gmra.mrb[4].mxu0 %v57_v51  ;;  %563 = vmatmul.mubr.f32.gmra.mrb[4].mxu1 %v65_v52 }
  0x2d   :  { %553 = vmatprep.mubr.f32.mxu0 %v58_v53  ;;  %565 = vmatprep.mubr.f32.mxu1 %v66_v54 }
  0x30   :  { %554 = vmatmul.mubr.f32.gmra.mrb[6].mxu0 %v59_v55  ;;  %566 = vmatmul.mubr.f32.gmra.mrb[6].mxu1 %v67_v56 }
  0x87   :  { %v789_v57 = vpop.permute.xlu1 %372  ;;  %v363_v58 = vpop.permute.xlu0 %362 }
  0x8b   :  { %v378_v59 = vpop.permute.xlu1 %377  ;;  %v368_v60 = vpop.permute.xlu0 %367 }
  0x8f   :  { %v791_v61 = vpop.permute.xlu1 %387  ;;  %v793_v62 = vpop.permute.xlu0 %382 }
  0x93   :  { %v795_v63 = vpop.permute.xlu1 %397  ;;  %v797_v0 = vpop.permute.xlu0 %392 }
  0x97   :  { %v408_v1 = vpop.permute.xlu1 %407  ;;  %v403_v2 = vpop.permute.xlu0 %402 }
  0x9b   :  { %v418_v9 = vpop.permute.xlu1 %417  ;;  %v413_v10 = vpop.permute.xlu0 %412 }
  0x9f   :  { %v428_v39 = vpop.permute.xlu1 %427  ;;  %v423_v43 = vpop.permute.xlu0 %422 }
  0xf7   :  { %v546_v3 = vpop.f32.mrb[0].mxu0  ;;  %v558_v4 = vpop.f32.mrb[0].mxu1 }
  0xf8   :  { %vm281_vm0 = vcmp.gt.f32.partialorder %v546_v3, 0.0  ;;  %v297_v5 = vmul.f32 0.01, %v546_v3  ;;  %vm289_vm1 = vcmp.gt.f32.partialorder %v558_v4, 0.0  ;;  %v305_v6 = vmul.f32 0.01, %v558_v4 }
  0xf9   :  { %v150_v7 = vpop.f32.mrb[1].mxu0  ;;  %v190_v8 = vpop.f32.mrb[1].mxu1 }
  0xfa   :  { %v313_v11 = vsel %vm281_vm0, %v546_v3, %v297_v5  ;;  %v321_v12 = vsel %vm289_vm1, %v558_v4, %v305_v6  ;;  %vm280_vm2 = vcmp.gt.f32.partialorder %v150_v7, 0.0  ;;  %v296_v13 = vmul.f32 0.01, %v150_v7 }
  0xfb   :  { %329 = vst [vmem:[%s906_s3 + $0x8] sm:$0xff] %v313_v11  ;;  %v441_v14 = vmul.f32 %v368_v60, %v313_v11  ;;  %337 = vst [vmem:[%s906_s3 + $0x48] sm:$0xff] %v321_v12  ;;  %v449_v15 = vmul.f32 %v408_v1, %v321_v12  ;;  %vm288_vm3 = vcmp.gt.f32.partialorder %v190_v8, 0.0  ;;  %v304_v16 = vmul.f32 0.01, %v190_v8  ;;  %v549_v17 = vpop.f32.mrb[2].mxu0 }
  0xfc   :  { %v561_v18 = vpop.f32.mrb[2].mxu1  ;;  %v312_v19 = vsel %vm280_vm2, %v150_v7, %v296_v13  ;;  %vm283_vm4 = vcmp.gt.f32.partialorder %v549_v17, 0.0  ;;  %v299_v20 = vmul.f32 0.01, %v549_v17  ;;  %v160_v21 = vpop.f32.mrb[3].mxu0 }
  0xfd   :  { %vm291_vm5 = vcmp.gt.f32.partialorder %v561_v18, 0.0  ;;  %v200_v22 = vpop.f32.mrb[3].mxu1  ;;  %457 = vst [vmem:[%s907_s4 + $0x8] sm:$0xff] %v441_v14  ;;  %465 = vst [vmem:[%s907_s4 + $0x48] sm:$0xff] %v449_v15  ;;  %v440_v23 = vmul.f32 %v363_v58, %v312_v19  ;;  %v320_v24 = vsel %vm288_vm3, %v190_v8, %v304_v16  ;;  %v307_v25 = vmul.f32 0.01, %v561_v18  ;;  %v433_v7 = vpop.permute.xlu0 %432 }
  0xfe   :  { %328 = vst [vmem:[%s906_s3] sm:$0xff] %v312_v19  ;;  %vm282_vm6 = vcmp.gt.f32.partialorder %v160_v21, 0.0  ;;  %336 = vst [vmem:[%s906_s3 + $0x40] sm:$0xff] %v320_v24  ;;  %v448_v26 = vmul.f32 %v403_v2, %v320_v24  ;;  %v315_v27 = vsel %vm283_vm4, %v549_v17, %v299_v20  ;;  %v298_v28 = vmul.f32 0.01, %v160_v21  ;;  %v438_v2 = vpop.permute.xlu1 %437 }
  0xff   :  { %vm290_vm7 = vcmp.gt.f32.partialorder %v200_v22, 0.0  ;;  %456 = vst [vmem:[%s907_s4] sm:$0xff] %v440_v23  ;;  %331 = vst [vmem:[%s906_s3 + $0x18] sm:$0xff] %v315_v27  ;;  %v443_v29 = vmul.f32 %v378_v59, %v315_v27  ;;  %v323_v30 = vsel %vm291_vm5, %v561_v18, %v307_v25  ;;  %v306_v31 = vmul.f32 0.01, %v200_v22  ;;  %v552_v32 = vpop.f32.mrb[4].mxu0  ;;  %v564_v33 = vpop.f32.mrb[4].mxu1 }
 0x100   :  { %464 = vst [vmem:[%s907_s4 + $0x40] sm:$0xff] %v448_v26  ;;  %339 = vst [vmem:[%s906_s3 + $0x58] sm:$0xff] %v323_v30  ;;  %v451_v34 = vmul.f32 %v418_v9, %v323_v30  ;;  %v314_v35 = vsel %vm282_vm6, %v160_v21, %v298_v28  ;;  %vm285_vm8 = vcmp.gt.f32.partialorder %v552_v32, 0.0  ;;  %v301_v36 = vmul.f32 0.01, %v552_v32  ;;  %v170_v37 = vpop.f32.mrb[5].mxu0 }
 0x101   :  { %v210_v38 = vpop.f32.mrb[5].mxu1  ;;  %459 = vst [vmem:[%s907_s4 + $0x18] sm:$0xff] %v443_v29  ;;  %330 = vst [vmem:[%s906_s3 + $0x10] sm:$0xff] %v314_v35  ;;  %v442_v40 = vmul.f32 %v789_v57, %v314_v35  ;;  %v322_v41 = vsel %vm290_vm7, %v200_v22, %v306_v31  ;;  %vm293_vm9 = vcmp.gt.f32.partialorder %v564_v33, 0.0  ;;  %v309_v42 = vmul.f32 0.01, %v564_v33 }
 0x102   :  { %467 = vst [vmem:[%s907_s4 + $0x58] sm:$0xff] %v451_v34  ;;  %338 = vst [vmem:[%s906_s3 + $0x50] sm:$0xff] %v322_v41  ;;  %v450_v44 = vmul.f32 %v413_v10, %v322_v41  ;;  %v317_v45 = vsel %vm285_vm8, %v552_v32, %v301_v36  ;;  %vm284_vm10 = vcmp.gt.f32.partialorder %v170_v37, 0.0  ;;  %v300_v46 = vmul.f32 0.01, %v170_v37 }
 0x103   :  { %458 = vst [vmem:[%s907_s4 + $0x10] sm:$0xff] %v442_v40  ;;  %333 = vst [vmem:[%s906_s3 + $0x28] sm:$0xff] %v317_v45  ;;  %v445_v47 = vmul.f32 %v791_v61, %v317_v45  ;;  %v325_v48 = vsel %vm293_vm9, %v564_v33, %v309_v42  ;;  %vm292_vm11 = vcmp.gt.f32.partialorder %v210_v38, 0.0  ;;  %v308_v49 = vmul.f32 0.01, %v210_v38  ;;  %v555_v50 = vpop.f32.mrb[6].mxu0 }
 0x104   :  { %v567_v51 = vpop.f32.mrb[6].mxu1  ;;  %466 = vst [vmem:[%s907_s4 + $0x50] sm:$0xff] %v450_v44  ;;  %341 = vst [vmem:[%s906_s3 + $0x68] sm:$0xff] %v325_v48  ;;  %v453_v52 = vmul.f32 %v428_v39, %v325_v48  ;;  %v316_v53 = vsel %vm284_vm10, %v170_v37, %v300_v46  ;;  %vm287_vm12 = vcmp.gt.f32.partialorder %v555_v50, 0.0  ;;  %v303_v54 = vmul.f32 0.01, %v555_v50 }
 0x105   :  { %v180_v55 = vpop.f32.mrb[7].mxu0  ;;  %v220_v56 = vpop.f32.mrb[7].mxu1  ;;  %461 = vst [vmem:[%s907_s4 + $0x28] sm:$0xff] %v445_v47  ;;  %332 = vst [vmem:[%s906_s3 + $0x20] sm:$0xff] %v316_v53  ;;  %v444_v57 = vmul.f32 %v793_v62, %v316_v53  ;;  %v324_v58 = vsel %vm292_vm11, %v210_v38, %v308_v49  ;;  %vm295_vm13 = vcmp.gt.f32.partialorder %v567_v51, 0.0 }
 0x106   :  { %v311_v59 = vmul.f32 0.01, %v567_v51  ;;  %469 = vst [vmem:[%s907_s4 + $0x68] sm:$0xff] %v453_v52  ;;  %340 = vst [vmem:[%s906_s3 + $0x60] sm:$0xff] %v324_v58  ;;  %v452_v60 = vmul.f32 %v423_v43, %v324_v58  ;;  %v319_v61 = vsel %vm287_vm12, %v555_v50, %v303_v54  ;;  %vm286_vm14 = vcmp.gt.f32.partialorder %v180_v55, 0.0 }
 0x107   :  { %v302_v1 = vmul.f32 0.01, %v180_v55  ;;  %460 = vst [vmem:[%s907_s4 + $0x20] sm:$0xff] %v444_v57  ;;  %335 = vst [vmem:[%s906_s3 + $0x38] sm:$0xff] %v319_v61  ;;  %v447_v62 = vmul.f32 %v795_v63, %v319_v61  ;;  %vm294_vm15 = vcmp.gt.f32.partialorder %v220_v56, 0.0 }
 0x108   :  { %v327_v3 = vsel %vm295_vm13, %v567_v51, %v311_v59  ;;  %v310_v4 = vmul.f32 0.01, %v220_v56  ;;  %468 = vst [vmem:[%s907_s4 + $0x60] sm:$0xff] %v452_v60 }
 0x109   :  { %343 = vst [vmem:[%s906_s3 + $0x78] sm:$0xff] %v327_v3  ;;  %v455_v5 = vmul.f32 %v438_v2, %v327_v3  ;;  %v318_v6 = vsel %vm286_vm14, %v180_v55, %v302_v1  ;;  %463 = vst [vmem:[%s907_s4 + $0x38] sm:$0xff] %v447_v62 }
 0x10a   :  { %334 = vst [vmem:[%s906_s3 + $0x30] sm:$0xff] %v318_v6  ;;  %v446_v63 = vmul.f32 %v797_v0, %v318_v6  ;;  %v326_v8 = vsel %vm294_vm15, %v220_v56, %v310_v4 }
 0x10b   :  { %471 = vst [vmem:[%s907_s4 + $0x78] sm:$0xff] %v455_v5  ;;  %342 = vst [vmem:[%s906_s3 + $0x70] sm:$0xff] %v326_v8  ;;  %v454_v9 = vmul.f32 %v433_v7, %v326_v8 }
 0x10c   :  { %462 = vst [vmem:[%s907_s4 + $0x30] sm:$0xff] %v446_v63 }
 0x10d   :  { %470 = vst [vmem:[%s907_s4 + $0x70] sm:$0xff] %v454_v9 }

// kernel: napgcn_forward.24
= control target key start
LH: loop header
LB: loop body
LE: loop exit
PB: predicated region body
PF: predicated region fallthrough
CT: control target
= control target key end

     0   :  { %s1156_s15 = smov 0   ;;  %s1158_s16 = smov 0   ;;  %s1350_s0 = inlined_call_operand.vmem [shape: f32[256,128], index: 0, kind: input, shape index: {}]   ;;  %s1351_s1 = inlined_call_operand.vmem [shape: f32[128,128], index: 1, kind: input, shape index: {}]   ;;  %s1352_s2 = inlined_call_operand.vmem [shape: f32[256,128], index: 2, kind: input, shape index: {}]   ;;  %s1353_s3 = inlined_call_operand.vmem [shape: f32[128,128], index: 3, kind: input, shape index: {}]   ;;  %s1354_s4 = inlined_call_operand.vmem [shape: f32[256,128], index: 4, kind: output, shape index: {}]  }
   0x1   :  { %s1160_s17 = smov 0  }
   0x2 LB: > { %s26_s18 = sadd.s32 1, %s1125_s16  ;;  %p818_p0 = scmp.ge.s32.totalorder %s1129_s17, 1  ;;  %s1129_s17 = sphi %s1160_s17, %s14_s17   ;;  %s1125_s16 = sphi %s1158_s16, %s1356_s16   ;;  %s1121_s15 = sphi %s1156_s15, %s1355_s15  }
   0x3   : > { %p28_p1 = scmp.ge.s32.totalorder %s26_s18, 2  ;;  %p206_p2 = scmp.lt.s32.totalorder %s1129_s17, 3 }
   0x5   : > { %s1358_s18 = smov (%p28_p1, %s26_s18), 0  ;;  %p207_p3 = pnand %p818_p0, %p206_p2 }
   0x6   : > { %v325_v0 = vld [vmem:[%s1353_s3] sm:$0xff] (!%p207_p3)  ;;  %v326_v1 = vld [vmem:[%s1353_s3 + $0x8] sm:$0xff] (!%p207_p3)  ;;  %s819_s25 = sshll.u32 (!%p207_p3), %s1121_s15, 4  ;;  %v327_v5 = vld [vmem:[%s1353_s3 + $0x10] sm:$0xff] (!%p207_p3) }
   0x7   : > { %210 = sbr.rel (%p207_p3) target bundleno = 289 (0x121), region = 36  ;;  %v293_v2 = vld [vmem:[%s1351_s1] sm:$0xff] (!%p207_p3)  ;;  %v1003_v3 = vpack.c.bf16 (!%p207_p3), %v326_v1, %v325_v0  ;;  %v294_v4 = vld [vmem:[%s1351_s1 + $0x8] sm:$0xff] (!%p207_p3)  ;;  %v328_v6 = vld [vmem:[%s1353_s3 + $0x18] sm:$0xff] (!%p207_p3)  ;;  %p249_p4 = scmp.lt.s32.totalorder (!%p207_p3), %s819_s25, 31 }
   0x8   : > { %v1035_v7 = vpack.c.bf16 (!%p207_p3), %v294_v4, %v293_v2  ;;  %v1007_v8 = vpack.c.bf16 (!%p207_p3), %v328_v6, %v327_v5  ;;  %v295_v9 = vld [vmem:[%s1351_s1 + $0x10] sm:$0xff] (!%p207_p3)  ;;  %v296_v10 = vld [vmem:[%s1351_s1 + $0x18] sm:$0xff] (!%p207_p3)  ;;  %v329_v11 = vld [vmem:[%s1353_s3 + $0x20] sm:$0xff] (!%p207_p3) }
   0x9   : > { %1004 = vmatprep.subr.bf16.mxu1 (!%p207_p3), %v1003_v3  ;;  %v1039_v12 = vpack.c.bf16 (!%p207_p3), %v296_v10, %v295_v9  ;;  %v330_v13 = vld [vmem:[%s1353_s3 + $0x28] sm:$0xff] (!%p207_p3)  ;;  %v297_v14 = vld [vmem:[%s1351_s1 + $0x20] sm:$0xff] (!%p207_p3)  ;;  %v331_v18 = vld [vmem:[%s1353_s3 + $0x30] sm:$0xff] (!%p207_p3) }
   0xa   : > { %v298_v15 = vld [vmem:[%s1351_s1 + $0x28] sm:$0xff] (!%p207_p3)  ;;  %1036 = vmatprep.subr.bf16.mxu0 (!%p207_p3), %v1035_v7  ;;  %1006 = vmatpush3.bf16.msra.mxu1 (!%p207_p3), %v1003_v3  ;;  %v1011_v16 = vpack.c.bf16 (!%p207_p3), %v330_v13, %v329_v11  ;;  %v332_v19 = vld [vmem:[%s1353_s3 + $0x38] sm:$0xff] (!%p207_p3)  ;;  %v299_v20 = vld [vmem:[%s1351_s1 + $0x30] sm:$0xff] (!%p207_p3) }
   0xb   : > { %1038 = vmatpush3.bf16.msra.mxu0 (!%p207_p3), %v1035_v7  ;;  %1008 = vmatprep.subr.bf16.mxu1 (!%p207_p3), %v1007_v8  ;;  %v1043_v17 = vpack.c.bf16 (!%p207_p3), %v298_v15, %v297_v14  ;;  %v300_v21 = vld [vmem:[%s1351_s1 + $0x38] sm:$0xff] (!%p207_p3)  ;;  %v1015_v22 = vpack.c.bf16 (!%p207_p3), %v332_v19, %v331_v18  ;;  %v333_v24 = vld [vmem:[%s1353_s3 + $0x40] sm:$0xff] (!%p207_p3)  ;;  %v334_v25 = vld [vmem:[%s1353_s3 + $0x48] sm:$0xff] (!%p207_p3) }
   0xc   : > { %1040 = vmatprep.subr.bf16.mxu0 (!%p207_p3), %v1039_v12  ;;  %v1047_v23 = vpack.c.bf16 (!%p207_p3), %v300_v21, %v299_v20  ;;  %v301_v27 = vld [vmem:[%s1351_s1 + $0x40] sm:$0xff] (!%p207_p3)  ;;  %v302_v28 = vld [vmem:[%s1351_s1 + $0x48] sm:$0xff] (!%p207_p3)  ;;  %v1019_v30 = vpack.c.bf16 (!%p207_p3), %v334_v25, %v333_v24  ;;  %v335_v32 = vld [vmem:[%s1353_s3 + $0x50] sm:$0xff] (!%p207_p3) }
   0xd   : > { %v1051_v31 = vpack.c.bf16 (!%p207_p3), %v302_v28, %v301_v27  ;;  %v336_v33 = vld [vmem:[%s1353_s3 + $0x58] sm:$0xff] (!%p207_p3)  ;;  %v303_v34 = vld [vmem:[%s1351_s1 + $0x50] sm:$0xff] (!%p207_p3)  ;;  %v337_v38 = vld [vmem:[%s1353_s3 + $0x60] sm:$0xff] (!%p207_p3) }
   0xe   : > { %s1360_s25 = smov (!%p249_p4, %s819_s25), 31  ;;  %1010 = vmatpush3.bf16.msra.mxu1 %v1007_v8  ;;  %v304_v35 = vld [vmem:[%s1351_s1 + $0x58] sm:$0xff]  ;;  %v1023_v36 = vpack.c.bf16 %v336_v33, %v335_v32  ;;  %v338_v39 = vld [vmem:[%s1353_s3 + $0x68] sm:$0xff]  ;;  %v305_v40 = vld [vmem:[%s1351_s1 + $0x60] sm:$0xff] }
   0xf   : > { %s1213_s21 = sshll.u32 %s1360_s25, 3  ;;  %1042 = vmatpush3.bf16.msra.mxu0 %v1039_v12  ;;  %1012 = vmatprep.subr.bf16.mxu1 %v1011_v16  ;;  %v1055_v37 = vpack.c.bf16 %v304_v35, %v303_v34  ;;  %v306_v41 = vld [vmem:[%s1351_s1 + $0x68] sm:$0xff]  ;;  %v1027_v42 = vpack.c.bf16 %v338_v39, %v337_v38  ;;  %v339_v44 = vld [vmem:[%s1353_s3 + $0x70] sm:$0xff]  ;;  %v340_v45 = vld [vmem:[%s1353_s3 + $0x78] sm:$0xff] }
  0x10   : > { %s1231_s6 = scalar_lea.vmem %s1352_s2, %s1213_s21  ;;  %s1237_s9 = scalar_lea.vmem %s1350_s0, %s1213_s21  ;;  %1044 = vmatprep.subr.bf16.mxu0 %v1043_v17  ;;  %v1059_v43 = vpack.c.bf16 %v306_v41, %v305_v40  ;;  %v307_v46 = vld [vmem:[%s1351_s1 + $0x70] sm:$0xff]  ;;  %v308_v47 = vld [vmem:[%s1351_s1 + $0x78] sm:$0xff]  ;;  %v1031_v48 = vpack.c.bf16 %v340_v45, %v339_v44 }
  0x11   : > { %v309_v26 = vld [vmem:[%s1231_s6] sm:$0xff]  ;;  %v1063_v49 = vpack.c.bf16 %v308_v47, %v307_v46  ;;  %v310_v50 = vld [vmem:[%s1231_s6 + $0x8] sm:$0xff]  ;;  %v311_v52 = vld [vmem:[%s1231_s6 + $0x10] sm:$0xff]  ;;  %s1323_s29 = scalar_lea.vmem %s1354_s4, %s1213_s21 }
  0x12   : > { %923 = vmatprep.mubr.f32.mxu1 %v309_v26  ;;  %v277_v29 = vld [vmem:[%s1237_s9] sm:$0xff]  ;;  %1014 = vmatpush3.bf16.msra.mxu1 %v1011_v16  ;;  %v278_v51 = vld [vmem:[%s1237_s9 + $0x8] sm:$0xff]  ;;  %v279_v53 = vld [vmem:[%s1237_s9 + $0x10] sm:$0xff] }
  0x13   : > { %979 = vmatprep.mubr.f32.mxu0 %v277_v29  ;;  %1046 = vmatpush3.bf16.msra.mxu0 %v1043_v17  ;;  %v312_v54 = vld [vmem:[%s1231_s6 + $0x18] sm:$0xff]  ;;  %v313_v56 = vld [vmem:[%s1231_s6 + $0x20] sm:$0xff]  ;;  %v314_v58 = vld [vmem:[%s1231_s6 + $0x28] sm:$0xff] }
  0x14   : > { %1016 = vmatprep.subr.bf16.mxu1 %v1015_v22  ;;  %1048 = vmatprep.subr.bf16.mxu0 %v1047_v23  ;;  %v280_v55 = vld [vmem:[%s1237_s9 + $0x18] sm:$0xff]  ;;  %v281_v57 = vld [vmem:[%s1237_s9 + $0x20] sm:$0xff]  ;;  %v282_v59 = vld [vmem:[%s1237_s9 + $0x28] sm:$0xff] }
  0x15   : > { %v315_v60 = vld [vmem:[%s1231_s6 + $0x30] sm:$0xff]  ;;  %v316_v62 = vld [vmem:[%s1231_s6 + $0x38] sm:$0xff]  ;;  %v317_v0 = vld [vmem:[%s1231_s6 + $0x40] sm:$0xff] }
  0x16   : > { %1018 = vmatpush3.bf16.msra.mxu1 %v1015_v22  ;;  %v283_v61 = vld [vmem:[%s1237_s9 + $0x30] sm:$0xff]  ;;  %v284_v63 = vld [vmem:[%s1237_s9 + $0x38] sm:$0xff]  ;;  %v285_v1 = vld [vmem:[%s1237_s9 + $0x40] sm:$0xff] }
  0x17   : > { %1050 = vmatpush3.bf16.msra.mxu0 %v1047_v23  ;;  %1020 = vmatprep.subr.bf16.mxu1 %v1019_v30  ;;  %v318_v2 = vld [vmem:[%s1231_s6 + $0x48] sm:$0xff]  ;;  %v319_v4 = vld [vmem:[%s1231_s6 + $0x50] sm:$0xff]  ;;  %v320_v6 = vld [vmem:[%s1231_s6 + $0x58] sm:$0xff] }
  0x18   : > { %1052 = vmatprep.subr.bf16.mxu0 %v1051_v31  ;;  %v286_v3 = vld [vmem:[%s1237_s9 + $0x48] sm:$0xff]  ;;  %v287_v5 = vld [vmem:[%s1237_s9 + $0x50] sm:$0xff]  ;;  %v288_v7 = vld [vmem:[%s1237_s9 + $0x58] sm:$0xff] }
  0x19   : > { %v321_v8 = vld [vmem:[%s1231_s6 + $0x60] sm:$0xff]  ;;  %v322_v10 = vld [vmem:[%s1231_s6 + $0x68] sm:$0xff]  ;;  %v323_v12 = vld [vmem:[%s1231_s6 + $0x70] sm:$0xff] }
  0x1a   : > { %1022 = vmatpush3.bf16.msra.mxu1 %v1019_v30  ;;  %v289_v9 = vld [vmem:[%s1237_s9 + $0x60] sm:$0xff]  ;;  %v290_v11 = vld [vmem:[%s1237_s9 + $0x68] sm:$0xff]  ;;  %v291_v13 = vld [vmem:[%s1237_s9 + $0x70] sm:$0xff] }
  0x1b   : > { %1054 = vmatpush3.bf16.msra.mxu0 %v1051_v31  ;;  %1024 = vmatprep.subr.bf16.mxu1 %v1023_v36  ;;  %v324_v14 = vld [vmem:[%s1231_s6 + $0x78] sm:$0xff] }
  0x1c   : > { %1056 = vmatprep.subr.bf16.mxu0 %v1055_v37  ;;  %v292_v15 = vld [vmem:[%s1237_s9 + $0x78] sm:$0xff] }
  0x1e   : > { %1026 = vmatpush3.bf16.msra.mxu1 %v1023_v36 }
  0x1f   : > { %1058 = vmatpush3.bf16.msra.mxu0 %v1055_v37  ;;  %1028 = vmatprep.subr.bf16.mxu1 %v1027_v42 }
  0x20   : > { %1060 = vmatprep.subr.bf16.mxu0 %v1059_v43 }
  0x22   : > { %1030 = vmatpush3.bf16.msra.mxu1 %v1027_v42 }
  0x23   : > { %1062 = vmatpush3.bf16.msra.mxu0 %v1059_v43  ;;  %1032 = vmatprep.subr.bf16.mxu1 %v1031_v48 }
  0x24   : > { %1064 = vmatprep.subr.bf16.mxu0 %v1063_v49 }
  0x26   : > { %1034 = vmatpush3.bf16.msra.mxu1 %v1031_v48 }
  0x27   : > { %1066 = vmatpush3.bf16.msra.mxu0 %v1063_v49 }
  0x29   : > { %924 = vmatmul.mubr.f32.vlgmr.msra.gmra.mrb[0].mxu1 %v310_v50 }
  0x2a   : > { %980 = vmatmul.mubr.f32.vlgmr.msra.gmra.mrb[0].mxu0 %v278_v51  ;;  %926 = vmatprep.mubr.f32.mxu1 %v311_v52 }
  0x2b   : > { %982 = vmatprep.mubr.f32.mxu0 %v279_v53 }
  0x2d   : > { %927 = vmatmul.mubr.f32.gmra.mrb[2].mxu1 %v312_v54 }
  0x2e   : > { %983 = vmatmul.mubr.f32.gmra.mrb[2].mxu0 %v280_v55  ;;  %929 = vmatprep.mubr.f32.mxu1 %v313_v56 }
  0x2f   : > { %985 = vmatprep.mubr.f32.mxu0 %v281_v57 }
  0x31   : > { %930 = vmatmul.mubr.f32.gmra.mrb[4].mxu1 %v314_v58 }
  0x32   : > { %986 = vmatmul.mubr.f32.gmra.mrb[4].mxu0 %v282_v59  ;;  %932 = vmatprep.mubr.f32.mxu1 %v315_v60 }
  0x33   : > { %988 = vmatprep.mubr.f32.mxu0 %v283_v61 }
  0x35   : > { %933 = vmatmul.mubr.f32.gmra.mrb[6].mxu1 %v316_v62 }
  0x36   : > { %989 = vmatmul.mubr.f32.gmra.mrb[6].mxu0 %v284_v63  ;;  %935 = vmatprep.mubr.f32.mxu1 %v317_v0 }
  0x37   : > { %991 = vmatprep.mubr.f32.mxu0 %v285_v1 }
  0x39   : > { %936 = vmatmul.mubr.f32.gmra.mrb[8].mxu1 %v318_v2 }
  0x3a   : > { %992 = vmatmul.mubr.f32.gmra.mrb[8].mxu0 %v286_v3  ;;  %938 = vmatprep.mubr.f32.mxu1 %v319_v4 }
  0x3b   : > { %994 = vmatprep.mubr.f32.mxu0 %v287_v5 }
  0x3d   : > { %939 = vmatmul.mubr.f32.gmra.mrb[10].mxu1 %v320_v6 }
  0x3e   : > { %995 = vmatmul.mubr.f32.gmra.mrb[10].mxu0 %v288_v7  ;;  %941 = vmatprep.mubr.f32.mxu1 %v321_v8 }
  0x3f   : > { %997 = vmatprep.mubr.f32.mxu0 %v289_v9 }
  0x41   : > { %942 = vmatmul.mubr.f32.gmra.mrb[12].mxu1 %v322_v10 }
  0x42   : > { %998 = vmatmul.mubr.f32.gmra.mrb[12].mxu0 %v290_v11  ;;  %944 = vmatprep.mubr.f32.mxu1 %v323_v12 }
  0x43   : > { %1000 = vmatprep.mubr.f32.mxu0 %v291_v13 }
  0x45   : > { %945 = vmatmul.mubr.f32.gmra.mrb[14].mxu1 %v324_v14 }
  0x46   : > { %1001 = vmatmul.mubr.f32.gmra.mrb[14].mxu0 %v292_v15 }
  0xfc   : > { %v925_v16 = vpop.f32.mrb[0].mxu1 }
  0xfd   : > { %v981_v17 = vpop.f32.mrb[0].mxu0  ;;  %v407_v18 = vpop.f32.mrb[1].mxu1 }
  0xfe   : > { %v558_v19 = vadd.f32 %v981_v17, %v925_v16  ;;  %v552_v20 = vpop.f32.mrb[1].mxu0 }
  0xff   : > { %v553_v21 = vadd.f32 %v552_v20, %v407_v18 }
 0x100   : > { %vm632_vm0 = vcmp.gt.f32.partialorder %v558_v19, 0.0  ;;  %v648_v22 = vmul.f32 0.01, %v558_v19  ;;  %v928_v23 = vpop.f32.mrb[2].mxu1 }
 0x101   : > { %vm631_vm1 = vcmp.gt.f32.partialorder %v553_v21, 0.0  ;;  %v647_v24 = vmul.f32 0.01, %v553_v21  ;;  %v984_v25 = vpop.f32.mrb[2].mxu0  ;;  %v417_v26 = vpop.f32.mrb[3].mxu1 }
 0x102   : > { %v664_v27 = vsel %vm632_vm0, %v558_v19, %v648_v22  ;;  %v568_v28 = vadd.f32 %v984_v25, %v928_v23  ;;  %v562_v29 = vpop.f32.mrb[3].mxu0 }
 0x103   : > { %680 = vst [vmem:[%s1323_s29 + $0x8] sm:$0xff] %v664_v27  ;;  %v663_v30 = vsel %vm631_vm1, %v553_v21, %v647_v24  ;;  %v563_v31 = vadd.f32 %v562_v29, %v417_v26 }
 0x104   : > { %679 = vst [vmem:[%s1323_s29] sm:$0xff] %v663_v30  ;;  %vm634_vm2 = vcmp.gt.f32.partialorder %v568_v28, 0.0  ;;  %v650_v32 = vmul.f32 0.01, %v568_v28  ;;  %v931_v33 = vpop.f32.mrb[4].mxu1 }
 0x105   : > { %vm633_vm3 = vcmp.gt.f32.partialorder %v563_v31, 0.0  ;;  %v649_v34 = vmul.f32 0.01, %v563_v31  ;;  %v987_v35 = vpop.f32.mrb[4].mxu0  ;;  %v427_v36 = vpop.f32.mrb[5].mxu1 }
 0x106   : > { %v666_v37 = vsel %vm634_vm2, %v568_v28, %v650_v32  ;;  %v578_v38 = vadd.f32 %v987_v35, %v931_v33  ;;  %v572_v39 = vpop.f32.mrb[5].mxu0 }
 0x107   : > { %682 = vst [vmem:[%s1323_s29 + $0x18] sm:$0xff] %v666_v37  ;;  %v665_v40 = vsel %vm633_vm3, %v563_v31, %v649_v34  ;;  %v573_v41 = vadd.f32 %v572_v39, %v427_v36 }
 0x108   : > { %681 = vst [vmem:[%s1323_s29 + $0x10] sm:$0xff] %v665_v40  ;;  %vm636_vm4 = vcmp.gt.f32.partialorder %v578_v38, 0.0  ;;  %v652_v42 = vmul.f32 0.01, %v578_v38  ;;  %v934_v43 = vpop.f32.mrb[6].mxu1 }
 0x109   : > { %vm635_vm5 = vcmp.gt.f32.partialorder %v573_v41, 0.0  ;;  %v651_v44 = vmul.f32 0.01, %v573_v41  ;;  %v990_v45 = vpop.f32.mrb[6].mxu0  ;;  %v437_v46 = vpop.f32.mrb[7].mxu1 }
 0x10a   : > { %v668_v47 = vsel %vm636_vm4, %v578_v38, %v652_v42  ;;  %v588_v48 = vadd.f32 %v990_v45, %v934_v43  ;;  %v582_v49 = vpop.f32.mrb[7].mxu0 }
 0x10b   : > { %684 = vst [vmem:[%s1323_s29 + $0x28] sm:$0xff] %v668_v47  ;;  %v667_v50 = vsel %vm635_vm5, %v573_v41, %v651_v44  ;;  %v583_v51 = vadd.f32 %v582_v49, %v437_v46 }
 0x10c   : > { %683 = vst [vmem:[%s1323_s29 + $0x20] sm:$0xff] %v667_v50  ;;  %vm638_vm6 = vcmp.gt.f32.partialorder %v588_v48, 0.0  ;;  %v654_v52 = vmul.f32 0.01, %v588_v48  ;;  %v937_v53 = vpop.f32.mrb[8].mxu1 }
 0x10d   : > { %vm637_vm7 = vcmp.gt.f32.partialorder %v583_v51, 0.0  ;;  %v653_v54 = vmul.f32 0.01, %v583_v51  ;;  %v993_v55 = vpop.f32.mrb[8].mxu0  ;;  %v447_v56 = vpop.f32.mrb[9].mxu1 }
 0x10e   : > { %v670_v57 = vsel %vm638_vm6, %v588_v48, %v654_v52  ;;  %v598_v58 = vadd.f32 %v993_v55, %v937_v53  ;;  %v592_v59 = vpop.f32.mrb[9].mxu0 }
 0x10f   : > { %686 = vst [vmem:[%s1323_s29 + $0x38] sm:$0xff] %v670_v57  ;;  %v669_v60 = vsel %vm637_vm7, %v583_v51, %v653_v54  ;;  %v593_v61 = vadd.f32 %v592_v59, %v447_v56 }
 0x110   : > { %685 = vst [vmem:[%s1323_s29 + $0x30] sm:$0xff] %v669_v60  ;;  %vm640_vm8 = vcmp.gt.f32.partialorder %v598_v58, 0.0  ;;  %v656_v62 = vmul.f32 0.01, %v598_v58  ;;  %v940_v63 = vpop.f32.mrb[10].mxu1 }
 0x111   : > { %vm639_vm9 = vcmp.gt.f32.partialorder %v593_v61, 0.0  ;;  %v655_v0 = vmul.f32 0.01, %v593_v61  ;;  %v996_v1 = vpop.f32.mrb[10].mxu0  ;;  %v457_v2 = vpop.f32.mrb[11].mxu1 }
 0x112   : > { %v672_v3 = vsel %vm640_vm8, %v598_v58, %v656_v62  ;;  %v608_v4 = vadd.f32 %v996_v1, %v940_v63  ;;  %v602_v5 = vpop.f32.mrb[11].mxu0 }
 0x113   : > { %688 = vst [vmem:[%s1323_s29 + $0x48] sm:$0xff] %v672_v3  ;;  %v671_v6 = vsel %vm639_vm9, %v593_v61, %v655_v0  ;;  %v603_v7 = vadd.f32 %v602_v5, %v457_v2 }
 0x114   : > { %687 = vst [vmem:[%s1323_s29 + $0x40] sm:$0xff] %v671_v6  ;;  %vm642_vm10 = vcmp.gt.f32.partialorder %v608_v4, 0.0  ;;  %v658_v8 = vmul.f32 0.01, %v608_v4  ;;  %v943_v9 = vpop.f32.mrb[12].mxu1 }
 0x115   : > { %vm641_vm11 = vcmp.gt.f32.partialorder %v603_v7, 0.0  ;;  %v657_v10 = vmul.f32 0.01, %v603_v7  ;;  %v999_v11 = vpop.f32.mrb[12].mxu0  ;;  %v467_v12 = vpop.f32.mrb[13].mxu1 }
 0x116   : > { %v674_v13 = vsel %vm642_vm10, %v608_v4, %v658_v8  ;;  %v618_v14 = vadd.f32 %v999_v11, %v943_v9  ;;  %v612_v15 = vpop.f32.mrb[13].mxu0 }
 0x117   : > { %690 = vst [vmem:[%s1323_s29 + $0x58] sm:$0xff] %v674_v13  ;;  %v673_v16 = vsel %vm641_vm11, %v603_v7, %v657_v10  ;;  %v613_v17 = vadd.f32 %v612_v15, %v467_v12 }
 0x118   : > { %689 = vst [vmem:[%s1323_s29 + $0x50] sm:$0xff] %v673_v16  ;;  %vm644_vm12 = vcmp.gt.f32.partialorder %v618_v14, 0.0  ;;  %v660_v18 = vmul.f32 0.01, %v618_v14  ;;  %v946_v19 = vpop.f32.mrb[14].mxu1 }
 0x119   : > { %vm643_vm13 = vcmp.gt.f32.partialorder %v613_v17, 0.0  ;;  %v659_v20 = vmul.f32 0.01, %v613_v17  ;;  %v1002_v21 = vpop.f32.mrb[14].mxu0  ;;  %v477_v22 = vpop.f32.mrb[15].mxu1 }
 0x11a   : > { %v676_v23 = vsel %vm644_vm12, %v618_v14, %v660_v18  ;;  %v628_v24 = vadd.f32 %v1002_v21, %v946_v19  ;;  %v622_v25 = vpop.f32.mrb[15].mxu0 }
 0x11b   : > { %692 = vst [vmem:[%s1323_s29 + $0x68] sm:$0xff] %v676_v23  ;;  %v675_v26 = vsel %vm643_vm13, %v613_v17, %v659_v20  ;;  %v623_v27 = vadd.f32 %v622_v25, %v477_v22 }
 0x11c   : > { %691 = vst [vmem:[%s1323_s29 + $0x60] sm:$0xff] %v675_v26  ;;  %vm646_vm14 = vcmp.gt.f32.partialorder %v628_v24, 0.0  ;;  %v662_v28 = vmul.f32 0.01, %v628_v24 }
 0x11d   : > { %vm645_vm15 = vcmp.gt.f32.partialorder %v623_v27, 0.0  ;;  %v661_v29 = vmul.f32 0.01, %v623_v27 }
 0x11e   : > { %v678_v30 = vsel %vm646_vm14, %v628_v24, %v662_v28 }
 0x11f   : > { %694 = vst [vmem:[%s1323_s29 + $0x78] sm:$0xff] %v678_v30  ;;  %v677_v31 = vsel %vm645_vm15, %v623_v27, %v661_v29 }
 0x120   : > { %693 = vst [vmem:[%s1323_s29 + $0x70] sm:$0xff] %v677_v31 }
 0x121 PF: > { %s14_s17 = sadd.s32 1, %s1129_s17   ;;  %s1355_s15 = smov %s1125_s16 }
 0x122   : > { %p11_p5 = scmp.ge.s32.totalorder %s14_s17, 4   ;;  %s1356_s16 = smov %s1358_s18 }
 0x124   :  { %13 = sbr.rel (!%p11_p5) target bundleno = 2 (0x2), region = 75 }

// kernel: napgcn_forward.22
= control target key start
LH: loop header
LB: loop body
LE: loop exit
PB: predicated region body
PF: predicated region fallthrough
CT: control target
= control target key end

     0   :  { %s1105_s3 = inlined_call_operand.vmem [shape: f32[128,128], index: 3, kind: input, shape index: {}]   ;;  %s1106_s1 = inlined_call_operand.vmem [shape: f32[256,128], index: 1, kind: input, shape index: {}]   ;;  %s1107_s2 = inlined_call_operand.vmem [shape: f32[128,128], index: 2, kind: input, shape index: {}]   ;;  %s1108_s0 = inlined_call_operand.vmem [shape: f32[128,256], index: 0, kind: input, shape index: {}]   ;;  %s1109_s4 = inlined_call_operand.vmem [shape: f32[128,128], index: 4, kind: output, shape index: {}]  }
   0x1   :  { %v97_v0 = vld [vmem:[%s1105_s3] sm:$0xff]  ;;  %v98_v1 = vld [vmem:[%s1105_s3 + $0x8] sm:$0xff]  ;;  %v99_v9 = vld [vmem:[%s1105_s3 + $0x10] sm:$0xff] }
   0x2   :  { %v65_v2 = vld [vmem:[%s1106_s1 + $0x80] sm:$0xff]  ;;  %v591_v3 = vpack.c.bf16 %v98_v1, %v97_v0  ;;  %v66_v4 = vld [vmem:[%s1106_s1 + $0x88] sm:$0xff]  ;;  %v100_v10 = vld [vmem:[%s1105_s3 + $0x18] sm:$0xff] }
   0x3   :  { %v49_v5 = vld [vmem:[%s1106_s1] sm:$0xff]  ;;  %v50_v6 = vld [vmem:[%s1106_s1 + $0x8] sm:$0xff]  ;;  %v714_v7 = vpack.c.bf16 %v66_v4, %v65_v2  ;;  %v67_v11 = vld [vmem:[%s1106_s1 + $0x90] sm:$0xff]  ;;  %v595_v12 = vpack.c.bf16 %v100_v10, %v99_v9 }
   0x4   :  { %v716_v8 = vpack.c.bf16 %v50_v6, %v49_v5  ;;  %592 = vmatprep.subr.bf16.mxu0 %v591_v3  ;;  %v68_v13 = vld [vmem:[%s1106_s1 + $0x98] sm:$0xff]  ;;  %v51_v14 = vld [vmem:[%s1106_s1 + $0x10] sm:$0xff]  ;;  %v101_v17 = vld [vmem:[%s1105_s3 + $0x20] sm:$0xff] }
   0x5   :  { %v52_v15 = vld [vmem:[%s1106_s1 + $0x18] sm:$0xff]  ;;  %655 = vmatprep.subr.bf16.mxu1 %v714_v7  ;;  %594 = vmatpush3.bf16.msra.mxu0 %v591_v3  ;;  %v737_v16 = vpack.c.bf16 %v68_v13, %v67_v11  ;;  %v102_v18 = vld [vmem:[%s1105_s3 + $0x28] sm:$0xff]  ;;  %v69_v19 = vld [vmem:[%s1106_s1 + $0xa0] sm:$0xff] }
   0x6   :  { %663 = vmatpush3.bf16.msra.mxu1 %v716_v8  ;;  %596 = vmatprep.subr.bf16.mxu0 %v595_v12  ;;  %v749_v20 = vpack.c.bf16 %v52_v15, %v51_v14  ;;  %v599_v21 = vpack.c.bf16 %v102_v18, %v101_v17  ;;  %v70_v22 = vld [vmem:[%s1106_s1 + $0xa8] sm:$0xff]  ;;  %v53_v23 = vld [vmem:[%s1106_s1 + $0x20] sm:$0xff]  ;;  %v103_v26 = vld [vmem:[%s1105_s3 + $0x30] sm:$0xff] }
   0x7   :  { %656 = vmatprep.subr.bf16.mxu1 %v737_v16  ;;  %v758_v24 = vpack.c.bf16 %v70_v22, %v69_v19  ;;  %v54_v25 = vld [vmem:[%s1106_s1 + $0x28] sm:$0xff]  ;;  %v104_v27 = vld [vmem:[%s1105_s3 + $0x38] sm:$0xff]  ;;  %v71_v28 = vld [vmem:[%s1106_s1 + $0xb0] sm:$0xff] }
   0x8   :  { %v72_v29 = vld [vmem:[%s1106_s1 + $0xb8] sm:$0xff]  ;;  %v776_v30 = vpack.c.bf16 %v54_v25, %v53_v23  ;;  %v603_v31 = vpack.c.bf16 %v104_v27, %v103_v26  ;;  %v55_v32 = vld [vmem:[%s1106_s1 + $0x30] sm:$0xff]  ;;  %v105_v35 = vld [vmem:[%s1105_s3 + $0x40] sm:$0xff] }
   0x9   :  { %598 = vmatpush3.bf16.msra.mxu0 %v595_v12  ;;  %v782_v33 = vpack.c.bf16 %v72_v29, %v71_v28  ;;  %v56_v34 = vld [vmem:[%s1106_s1 + $0x38] sm:$0xff]  ;;  %v106_v36 = vld [vmem:[%s1105_s3 + $0x48] sm:$0xff]  ;;  %v73_v37 = vld [vmem:[%s1106_s1 + $0xc0] sm:$0xff] }
   0xa   :  { %664 = vmatpush3.bf16.msra.mxu1 %v749_v20  ;;  %600 = vmatprep.subr.bf16.mxu0 %v599_v21  ;;  %v74_v38 = vld [vmem:[%s1106_s1 + $0xc8] sm:$0xff]  ;;  %v800_v39 = vpack.c.bf16 %v56_v34, %v55_v32  ;;  %v607_v40 = vpack.c.bf16 %v106_v36, %v105_v35  ;;  %v57_v41 = vld [vmem:[%s1106_s1 + $0x40] sm:$0xff]  ;;  %v107_v44 = vld [vmem:[%s1105_s3 + $0x50] sm:$0xff] }
   0xb   :  { %657 = vmatprep.subr.bf16.mxu1 %v758_v24  ;;  %v806_v42 = vpack.c.bf16 %v74_v38, %v73_v37  ;;  %v58_v43 = vld [vmem:[%s1106_s1 + $0x48] sm:$0xff]  ;;  %v108_v45 = vld [vmem:[%s1105_s3 + $0x58] sm:$0xff]  ;;  %v75_v46 = vld [vmem:[%s1106_s1 + $0xd0] sm:$0xff] }
   0xc   :  { %v76_v47 = vld [vmem:[%s1106_s1 + $0xd8] sm:$0xff]  ;;  %v81_v48 = vld [vmem:[%s1107_s2] sm:$0xff]  ;;  %v26_v49 = vld [vmem:[%s1108_s0 + $0x48] sm:$0xff]  ;;  %v830_v50 = vpack.c.bf16 %v58_v43, %v57_v41  ;;  %v611_v51 = vpack.c.bf16 %v108_v45, %v107_v44 }
   0xd   :  { %602 = vmatpush3.bf16.msra.mxu0 %v599_v21  ;;  %v59_v52 = vld [vmem:[%s1106_s1 + $0x50] sm:$0xff]  ;;  %v836_v53 = vpack.c.bf16 %v76_v47, %v75_v46  ;;  %v60_v54 = vld [vmem:[%s1106_s1 + $0x58] sm:$0xff]  ;;  %v109_v55 = vld [vmem:[%s1105_s3 + $0x60] sm:$0xff]  ;;  %567 = vmatprep.mubr.f32.mxu0 %v81_v48 }
   0xe   :  { %665 = vmatpush3.bf16.msra.mxu1 %v776_v30  ;;  %604 = vmatprep.subr.bf16.mxu0 %v603_v31  ;;  %v110_v56 = vld [vmem:[%s1105_s3 + $0x68] sm:$0xff]  ;;  %v77_v57 = vld [vmem:[%s1106_s1 + $0xe0] sm:$0xff]  ;;  %v854_v59 = vpack.c.bf16 %v60_v54, %v59_v52  ;;  %v111_v0 = vld [vmem:[%s1105_s3 + $0x70] sm:$0xff] }
   0xf   :  { %658 = vmatprep.subr.bf16.mxu1 %v782_v33  ;;  %v78_v58 = vld [vmem:[%s1106_s1 + $0xe8] sm:$0xff]  ;;  %342 = vmatprep.mubr.f32.mxu1 %v26_v49  ;;  %v615_v60 = vpack.c.bf16 %v110_v56, %v109_v55  ;;  %v61_v61 = vld [vmem:[%s1106_s1 + $0x60] sm:$0xff]  ;;  %v112_v1 = vld [vmem:[%s1105_s3 + $0x78] sm:$0xff] }
  0x10   :  { %v860_v62 = vpack.c.bf16 %v78_v58, %v77_v57  ;;  %v62_v63 = vld [vmem:[%s1106_s1 + $0x68] sm:$0xff]  ;;  %v79_v2 = vld [vmem:[%s1106_s1 + $0xf0] sm:$0xff]  ;;  %v80_v3 = vld [vmem:[%s1106_s1 + $0xf8] sm:$0xff]  ;;  %v619_v5 = vpack.c.bf16 %v112_v1, %v111_v0 }
  0x11   :  { %606 = vmatpush3.bf16.msra.mxu0 %v603_v31  ;;  %v878_v4 = vpack.c.bf16 %v62_v63, %v61_v61  ;;  %v881_v6 = vpack.c.bf16 %v80_v3, %v79_v2  ;;  %v63_v9 = vld [vmem:[%s1106_s1 + $0x70] sm:$0xff]  ;;  %v64_v10 = vld [vmem:[%s1106_s1 + $0x78] sm:$0xff]  ;;  %v82_v12 = vld [vmem:[%s1107_s2 + $0x8] sm:$0xff] }
  0x12   :  { %666 = vmatpush3.bf16.msra.mxu1 %v800_v39  ;;  %608 = vmatprep.subr.bf16.mxu0 %v607_v40  ;;  %v890_v11 = vpack.c.bf16 %v64_v10, %v63_v9  ;;  %v25_v13 = vld [vmem:[%s1108_s0 + $0x40] sm:$0xff]  ;;  %v83_v14 = vld [vmem:[%s1107_s2 + $0x10] sm:$0xff]  ;;  %v28_v15 = vld [vmem:[%s1108_s0 + $0x58] sm:$0xff] }
  0x13   :  { %659 = vmatprep.subr.bf16.mxu1 %v806_v42  ;;  %v27_v17 = vld [vmem:[%s1108_s0 + $0x50] sm:$0xff]  ;;  %v85_v18 = vld [vmem:[%s1107_s2 + $0x20] sm:$0xff]  ;;  %v86_v19 = vld [vmem:[%s1107_s2 + $0x28] sm:$0xff] }
  0x14   :  { %v87_v21 = vld [vmem:[%s1107_s2 + $0x30] sm:$0xff]  ;;  %v88_v22 = vld [vmem:[%s1107_s2 + $0x38] sm:$0xff]  ;;  %v34_v25 = vld [vmem:[%s1108_s0 + $0x88] sm:$0xff] }
  0x15   :  { %610 = vmatpush3.bf16.msra.mxu0 %v607_v40  ;;  %v31_v23 = vld [vmem:[%s1108_s0 + $0x70] sm:$0xff]  ;;  %v90_v26 = vld [vmem:[%s1107_s2 + $0x48] sm:$0xff]  ;;  %v33_v27 = vld [vmem:[%s1108_s0 + $0x80] sm:$0xff] }
  0x16   :  { %667 = vmatpush3.bf16.msra.mxu1 %v830_v50  ;;  %612 = vmatprep.subr.bf16.mxu0 %v611_v51  ;;  %v91_v28 = vld [vmem:[%s1107_s2 + $0x50] sm:$0xff]  ;;  %v36_v29 = vld [vmem:[%s1108_s0 + $0x98] sm:$0xff]  ;;  %v93_v32 = vld [vmem:[%s1107_s2 + $0x60] sm:$0xff] }
  0x17   :  { %660 = vmatprep.subr.bf16.mxu1 %v836_v53  ;;  %v35_v31 = vld [vmem:[%s1108_s0 + $0x90] sm:$0xff]  ;;  %v94_v34 = vld [vmem:[%s1107_s2 + $0x68] sm:$0xff]  ;;  %v37_v35 = vld [vmem:[%s1108_s0 + $0xa0] sm:$0xff] }
  0x18   :  { %v95_v36 = vld [vmem:[%s1107_s2 + $0x70] sm:$0xff]  ;;  %v40_v37 = vld [vmem:[%s1108_s0 + $0xb8] sm:$0xff]  ;;  %v18_v40 = vld [vmem:[%s1108_s0 + $0x8] sm:$0xff] }
  0x19   :  { %614 = vmatpush3.bf16.msra.mxu0 %v611_v51  ;;  %v96_v38 = vld [vmem:[%s1107_s2 + $0x78] sm:$0xff]  ;;  %v42_v41 = vld [vmem:[%s1108_s0 + $0xc8] sm:$0xff]  ;;  %v41_v43 = vld [vmem:[%s1108_s0 + $0xc0] sm:$0xff] }
  0x1a   :  { %668 = vmatpush3.bf16.msra.mxu1 %v854_v59  ;;  %616 = vmatprep.subr.bf16.mxu0 %v615_v60  ;;  %v20_v44 = vld [vmem:[%s1108_s0 + $0x18] sm:$0xff]  ;;  %v19_v46 = vld [vmem:[%s1108_s0 + $0x10] sm:$0xff]  ;;  %v22_v48 = vld [vmem:[%s1108_s0 + $0x28] sm:$0xff] }
  0x1b   :  { %661 = vmatprep.subr.bf16.mxu1 %v860_v62  ;;  %v44_v45 = vld [vmem:[%s1108_s0 + $0xd8] sm:$0xff]  ;;  %v43_v47 = vld [vmem:[%s1108_s0 + $0xd0] sm:$0xff]  ;;  %v46_v49 = vld [vmem:[%s1108_s0 + $0xe8] sm:$0xff] }
  0x1c   :  { %v45_v51 = vld [vmem:[%s1108_s0 + $0xe0] sm:$0xff]  ;;  %v24_v52 = vld [vmem:[%s1108_s0 + $0x38] sm:$0xff]  ;;  %v23_v54 = vld [vmem:[%s1108_s0 + $0x30] sm:$0xff] }
  0x1d   :  { %618 = vmatpush3.bf16.msra.mxu0 %v615_v60  ;;  %v47_v55 = vld [vmem:[%s1108_s0 + $0xf0] sm:$0xff] }
  0x1e   :  { %669 = vmatpush3.bf16.msra.mxu1 %v878_v4  ;;  %620 = vmatprep.subr.bf16.mxu0 %v619_v5 }
  0x1f   :  { %662 = vmatprep.subr.bf16.mxu1 %v881_v6 }
  0x21   :  { %622 = vmatpush3.bf16.msra.mxu0 %v619_v5 }
  0x22   :  { %670 = vmatpush3.bf16.msra.mxu1 %v890_v11  ;;  %624 = vmatprep.subr.bf16.mxu0 %v714_v7  ;;  %v84_v7 = vld [vmem:[%s1107_s2 + $0x18] sm:$0xff] }
  0x24   :  { %568 = vmatmul.mubr.f32.vlgmr.msra.gmra.mrb[0].mxu0 %v82_v12 }
  0x25   :  { %343 = vmatmul.mubr.f32.vlgmr.msra.gmra.mrb[0].mxu1 %v25_v13  ;;  %626 = vmatpush3.bf16.msra.mxu0 %v716_v8  ;;  %v30_v8 = vld [vmem:[%s1108_s0 + $0x68] sm:$0xff] }
  0x26   :  { %570 = vmatprep.mubr.f32.mxu0 %v83_v14  ;;  %347 = vmatprep.mubr.f32.mxu1 %v28_v15 }
  0x27   :  { %628 = vmatprep.subr.bf16.mxu0 %v737_v16  ;;  %v29_v16 = vld [vmem:[%s1108_s0 + $0x60] sm:$0xff] }
  0x28   :  { %571 = vmatmul.mubr.f32.gmra.mrb[2].mxu0 %v84_v7 }
  0x29   :  { %348 = vmatmul.mubr.f32.gmra.mrb[2].mxu1 %v27_v17  ;;  %630 = vmatpush3.bf16.msra.mxu0 %v749_v20  ;;  %v32_v20 = vld [vmem:[%s1108_s0 + $0x78] sm:$0xff] }
  0x2a   :  { %573 = vmatprep.mubr.f32.mxu0 %v85_v18  ;;  %352 = vmatprep.mubr.f32.mxu1 %v30_v8 }
  0x2b   :  { %632 = vmatprep.subr.bf16.mxu0 %v758_v24  ;;  %v89_v24 = vld [vmem:[%s1107_s2 + $0x40] sm:$0xff] }
  0x2c   :  { %574 = vmatmul.mubr.f32.gmra.mrb[4].mxu0 %v86_v19 }
  0x2d   :  { %353 = vmatmul.mubr.f32.gmra.mrb[4].mxu1 %v29_v16  ;;  %634 = vmatpush3.bf16.msra.mxu0 %v776_v30  ;;  %v92_v30 = vld [vmem:[%s1107_s2 + $0x58] sm:$0xff] }
  0x2e   :  { %576 = vmatprep.mubr.f32.mxu0 %v87_v21  ;;  %357 = vmatprep.mubr.f32.mxu1 %v32_v20 }
  0x2f   :  { %636 = vmatprep.subr.bf16.mxu0 %v782_v33  ;;  %v38_v33 = vld [vmem:[%s1108_s0 + $0xa8] sm:$0xff] }
  0x30   :  { %577 = vmatmul.mubr.f32.gmra.mrb[6].mxu0 %v88_v22 }
  0x31   :  { %358 = vmatmul.mubr.f32.gmra.mrb[6].mxu1 %v31_v23  ;;  %638 = vmatpush3.bf16.msra.mxu0 %v800_v39  ;;  %v39_v39 = vld [vmem:[%s1108_s0 + $0xb0] sm:$0xff] }
  0x32   :  { %579 = vmatprep.mubr.f32.mxu0 %v89_v24  ;;  %362 = vmatprep.mubr.f32.mxu1 %v34_v25 }
  0x33   :  { %640 = vmatprep.subr.bf16.mxu0 %v806_v42  ;;  %v17_v42 = vld [vmem:[%s1108_s0] sm:$0xff] }
  0x34   :  { %580 = vmatmul.mubr.f32.gmra.mrb[8].mxu0 %v90_v26 }
  0x35   :  { %363 = vmatmul.mubr.f32.gmra.mrb[8].mxu1 %v33_v27  ;;  %642 = vmatpush3.bf16.msra.mxu0 %v830_v50  ;;  %v21_v50 = vld [vmem:[%s1108_s0 + $0x20] sm:$0xff] }
  0x36   :  { %582 = vmatprep.mubr.f32.mxu0 %v91_v28  ;;  %367 = vmatprep.mubr.f32.mxu1 %v36_v29 }
  0x37   :  { %644 = vmatprep.subr.bf16.mxu0 %v836_v53  ;;  %v48_v53 = vld [vmem:[%s1108_s0 + $0xf8] sm:$0xff] }
  0x38   :  { %583 = vmatmul.mubr.f32.gmra.mrb[10].mxu0 %v92_v30 }
  0x39   :  { %368 = vmatmul.mubr.f32.gmra.mrb[10].mxu1 %v35_v31  ;;  %646 = vmatpush3.bf16.msra.mxu0 %v854_v59 }
  0x3a   :  { %585 = vmatprep.mubr.f32.mxu0 %v93_v32  ;;  %372 = vmatprep.mubr.f32.mxu1 %v38_v33 }
  0x3b   :  { %648 = vmatprep.subr.bf16.mxu0 %v860_v62 }
  0x3c   :  { %586 = vmatmul.mubr.f32.gmra.mrb[12].mxu0 %v94_v34 }
  0x3d   :  { %373 = vmatmul.mubr.f32.gmra.mrb[12].mxu1 %v37_v35  ;;  %650 = vmatpush3.bf16.msra.mxu0 %v878_v4 }
  0x3e   :  { %588 = vmatprep.mubr.f32.mxu0 %v95_v36  ;;  %377 = vmatprep.mubr.f32.mxu1 %v40_v37 }
  0x3f   :  { %652 = vmatprep.subr.bf16.mxu0 %v881_v6 }
  0x40   :  { %589 = vmatmul.mubr.f32.gmra.mrb[14].mxu0 %v96_v38 }
  0x41   :  { %378 = vmatmul.mubr.f32.gmra.mrb[14].mxu1 %v39_v39  ;;  %654 = vmatpush3.bf16.msra.mxu0 %v890_v11 }
  0x42   :  { %322 = vmatprep.mubr.f32.mxu0 %v18_v40  ;;  %382 = vmatprep.mubr.f32.mxu1 %v42_v41 }
  0x44   :  { %323 = vmatmul.mubr.f32.vlgmr.msra.gmra.mrb[16].mxu0 %v17_v42 }
  0x45   :  { %383 = vmatmul.mubr.f32.gmra.mrb[16].mxu1 %v41_v43  ;;  %327 = vmatprep.mubr.f32.mxu0 %v20_v44 }
  0x46   :  { %387 = vmatprep.mubr.f32.mxu1 %v44_v45 }
  0x48   :  { %328 = vmatmul.mubr.f32.gmra.mrb[18].mxu0 %v19_v46 }
  0x49   :  { %388 = vmatmul.mubr.f32.gmra.mrb[18].mxu1 %v43_v47  ;;  %332 = vmatprep.mubr.f32.mxu0 %v22_v48 }
  0x4a   :  { %392 = vmatprep.mubr.f32.mxu1 %v46_v49 }
  0x4c   :  { %333 = vmatmul.mubr.f32.gmra.mrb[20].mxu0 %v21_v50 }
  0x4d   :  { %393 = vmatmul.mubr.f32.gmra.mrb[20].mxu1 %v45_v51  ;;  %337 = vmatprep.mubr.f32.mxu0 %v24_v52 }
  0x4e   :  { %397 = vmatprep.mubr.f32.mxu1 %v48_v53 }
  0x50   :  { %338 = vmatmul.mubr.f32.gmra.mrb[22].mxu0 %v23_v54 }
  0x51   :  { %398 = vmatmul.mubr.f32.gmra.mrb[22].mxu1 %v47_v55 }
  0xf7   :  { %v1048_v56 = vpop.f32.mrb[0].mxu0 }
  0xf8   :  { %v499_v57 = vpop.f32.mrb[0].mxu1  ;;  %v179_v58 = vpop.f32.mrb[1].mxu0 }
  0xf9   :  { %v500_v59 = vpop.f32.mrb[1].mxu1 }
  0xfa   :  { %v501_v60 = vadd.f32 %v500_v59, %v499_v57 }
  0xfb   :  { %v1050_v61 = vpop.f32.mrb[2].mxu0 }
  0xfc   :  { %v502_v62 = vpop.f32.mrb[2].mxu1  ;;  %v1052_v63 = vpop.f32.mrb[3].mxu0 }
  0xfd   :  { %v503_v0 = vpop.f32.mrb[3].mxu1 }
  0xfe   :  { %v504_v1 = vadd.f32 %v503_v0, %v502_v62 }
  0xff   :  { %v575_v2 = vpop.f32.mrb[4].mxu0 }
 0x100   :  { %v350_v3 = vadd.f32 %v575_v2, %v504_v1  ;;  %v505_v4 = vpop.f32.mrb[4].mxu1  ;;  %v199_v5 = vpop.f32.mrb[5].mxu0 }
 0x101   :  { %v345_v6 = vadd.f32 %v501_v60, %v199_v5  ;;  %v506_v9 = vpop.f32.mrb[5].mxu1 }
 0x102   :  { %408 = vst [vmem:[%s1109_s4 + $0x28] sm:$0xff] %v350_v3  ;;  %v507_v10 = vadd.f32 %v506_v9, %v505_v4 }
 0x103   :  { %407 = vst [vmem:[%s1109_s4 + $0x20] sm:$0xff] %v345_v6  ;;  %v578_v11 = vpop.f32.mrb[6].mxu0 }
 0x104   :  { %v508_v12 = vpop.f32.mrb[6].mxu1  ;;  %v209_v13 = vpop.f32.mrb[7].mxu0 }
 0x105   :  { %v355_v14 = vadd.f32 %v507_v10, %v209_v13  ;;  %v509_v15 = vpop.f32.mrb[7].mxu1 }
 0x106   :  { %v510_v7 = vadd.f32 %v509_v15, %v508_v12 }
 0x107   :  { %409 = vst [vmem:[%s1109_s4 + $0x30] sm:$0xff] %v355_v14  ;;  %v581_v17 = vpop.f32.mrb[8].mxu0 }
 0x108   :  { %v360_v18 = vadd.f32 %v578_v11, %v510_v7  ;;  %v511_v8 = vpop.f32.mrb[8].mxu1  ;;  %v219_v19 = vpop.f32.mrb[9].mxu0 }
 0x109   :  { %v512_v16 = vpop.f32.mrb[9].mxu1 }
 0x10a   :  { %410 = vst [vmem:[%s1109_s4 + $0x38] sm:$0xff] %v360_v18  ;;  %v513_v21 = vadd.f32 %v512_v16, %v511_v8 }
 0x10b   :  { %v584_v20 = vpop.f32.mrb[10].mxu0 }
 0x10c   :  { %v365_v22 = vadd.f32 %v513_v21, %v219_v19  ;;  %v514_v23 = vpop.f32.mrb[10].mxu1  ;;  %v229_v24 = vpop.f32.mrb[11].mxu0 }
 0x10d   :  { %v515_v25 = vpop.f32.mrb[11].mxu1 }
 0x10e   :  { %411 = vst [vmem:[%s1109_s4 + $0x40] sm:$0xff] %v365_v22  ;;  %v516_v26 = vadd.f32 %v515_v25, %v514_v23 }
 0x10f   :  { %v587_v27 = vpop.f32.mrb[12].mxu0 }
 0x110   :  { %v370_v28 = vadd.f32 %v581_v17, %v516_v26  ;;  %v517_v29 = vpop.f32.mrb[12].mxu1  ;;  %v239_v30 = vpop.f32.mrb[13].mxu0 }
 0x111   :  { %v518_v31 = vpop.f32.mrb[13].mxu1 }
 0x112   :  { %412 = vst [vmem:[%s1109_s4 + $0x48] sm:$0xff] %v370_v28  ;;  %v519_v32 = vadd.f32 %v518_v31, %v517_v29 }
 0x113   :  { %v590_v33 = vpop.f32.mrb[14].mxu0 }
 0x114   :  { %v375_v34 = vadd.f32 %v519_v32, %v229_v24  ;;  %v520_v35 = vpop.f32.mrb[14].mxu1  ;;  %v249_v36 = vpop.f32.mrb[15].mxu0 }
 0x115   :  { %v521_v37 = vpop.f32.mrb[15].mxu1 }
 0x116   :  { %413 = vst [vmem:[%s1109_s4 + $0x50] sm:$0xff] %v375_v34  ;;  %v522_v38 = vadd.f32 %v521_v37, %v520_v35 }
 0x117   :  { %v487_v39 = vpop.f32.mrb[16].mxu0 }
 0x118   :  { %v380_v40 = vadd.f32 %v584_v20, %v522_v38  ;;  %v523_v41 = vpop.f32.mrb[16].mxu1  ;;  %v488_v42 = vpop.f32.mrb[17].mxu0 }
 0x119   :  { %v489_v43 = vadd.f32 %v488_v42, %v487_v39  ;;  %v524_v44 = vpop.f32.mrb[17].mxu1 }
 0x11a   :  { %414 = vst [vmem:[%s1109_s4 + $0x58] sm:$0xff] %v380_v40  ;;  %v525_v45 = vadd.f32 %v524_v44, %v523_v41 }
 0x11b   :  { %v325_v46 = vadd.f32 %v489_v43, %v179_v58  ;;  %v490_v47 = vpop.f32.mrb[18].mxu0 }
 0x11c   :  { %v385_v48 = vadd.f32 %v525_v45, %v239_v30  ;;  %v526_v49 = vpop.f32.mrb[18].mxu1  ;;  %v491_v50 = vpop.f32.mrb[19].mxu0 }
 0x11d   :  { %403 = vst [vmem:[%s1109_s4] sm:$0xff] %v325_v46  ;;  %v492_v51 = vadd.f32 %v491_v50, %v490_v47  ;;  %v527_v52 = vpop.f32.mrb[19].mxu1 }
 0x11e   :  { %415 = vst [vmem:[%s1109_s4 + $0x60] sm:$0xff] %v385_v48  ;;  %v528_v53 = vadd.f32 %v527_v52, %v526_v49 }
 0x11f   :  { %v330_v54 = vadd.f32 %v1048_v56, %v492_v51  ;;  %v493_v55 = vpop.f32.mrb[20].mxu0 }
 0x120   :  { %v390_v57 = vadd.f32 %v587_v27, %v528_v53  ;;  %v529_v58 = vpop.f32.mrb[20].mxu1  ;;  %v494_v59 = vpop.f32.mrb[21].mxu0 }
 0x121   :  { %404 = vst [vmem:[%s1109_s4 + $0x8] sm:$0xff] %v330_v54  ;;  %v495_v60 = vadd.f32 %v494_v59, %v493_v55  ;;  %v530_v62 = vpop.f32.mrb[21].mxu1 }
 0x122   :  { %416 = vst [vmem:[%s1109_s4 + $0x68] sm:$0xff] %v390_v57  ;;  %v531_v0 = vadd.f32 %v530_v62, %v529_v58 }
 0x123   :  { %v335_v1 = vadd.f32 %v495_v60, %v1052_v63  ;;  %v496_v2 = vpop.f32.mrb[22].mxu0 }
 0x124   :  { %v395_v3 = vadd.f32 %v531_v0, %v249_v36  ;;  %v532_v56 = vpop.f32.mrb[22].mxu1  ;;  %v497_v4 = vpop.f32.mrb[23].mxu0 }
 0x125   :  { %405 = vst [vmem:[%s1109_s4 + $0x10] sm:$0xff] %v335_v1  ;;  %v498_v5 = vadd.f32 %v497_v4, %v496_v2  ;;  %v533_v6 = vpop.f32.mrb[23].mxu1 }
 0x126   :  { %417 = vst [vmem:[%s1109_s4 + $0x70] sm:$0xff] %v395_v3  ;;  %v534_v9 = vadd.f32 %v533_v6, %v532_v56 }
 0x127   :  { %v340_v10 = vadd.f32 %v1050_v61, %v498_v5 }
 0x128   :  { %v400_v11 = vadd.f32 %v590_v33, %v534_v9 }
 0x129   :  { %406 = vst [vmem:[%s1109_s4 + $0x18] sm:$0xff] %v340_v10 }
 0x12a   :  { %418 = vst [vmem:[%s1109_s4 + $0x78] sm:$0xff] %v400_v11 }

// kernel: napgcn_forward.25
= control target key start
LH: loop header
LB: loop body
LE: loop exit
PB: predicated region body
PF: predicated region fallthrough
CT: control target
= control target key end

     0   :  { %s912_s3 = inlined_call_operand.vmem [shape: f32[128,128], index: 3, kind: input, shape index: {}]   ;;  %s913_s1 = inlined_call_operand.vmem [shape: f32[128,128], index: 1, kind: input, shape index: {}]   ;;  %s914_s2 = inlined_call_operand.vmem [shape: f32[128,128], index: 2, kind: input, shape index: {}]   ;;  %s915_s0 = inlined_call_operand.vmem [shape: f32[128,128], index: 0, kind: input, shape index: {}]   ;;  %s916_s4 = inlined_call_operand.vmem [shape: f32[128,128], index: 4, kind: output, shape index: {}]  }
   0x1   :  { %v65_v0 = vld [vmem:[%s912_s3] sm:$0xff]  ;;  %v66_v1 = vld [vmem:[%s912_s3 + $0x8] sm:$0xff]  ;;  %v67_v5 = vld [vmem:[%s912_s3 + $0x10] sm:$0xff] }
   0x2   :  { %v33_v2 = vld [vmem:[%s913_s1] sm:$0xff]  ;;  %v567_v3 = vpack.c.bf16 %v66_v1, %v65_v0  ;;  %v34_v4 = vld [vmem:[%s913_s1 + $0x8] sm:$0xff]  ;;  %v68_v6 = vld [vmem:[%s912_s3 + $0x18] sm:$0xff] }
   0x3   :  { %v599_v7 = vpack.c.bf16 %v34_v4, %v33_v2  ;;  %v571_v8 = vpack.c.bf16 %v68_v6, %v67_v5  ;;  %v35_v9 = vld [vmem:[%s913_s1 + $0x10] sm:$0xff]  ;;  %v36_v10 = vld [vmem:[%s913_s1 + $0x18] sm:$0xff]  ;;  %v69_v11 = vld [vmem:[%s912_s3 + $0x20] sm:$0xff] }
   0x4   :  { %568 = vmatprep.subr.bf16.mxu1 %v567_v3  ;;  %v603_v12 = vpack.c.bf16 %v36_v10, %v35_v9  ;;  %v70_v13 = vld [vmem:[%s912_s3 + $0x28] sm:$0xff]  ;;  %v37_v14 = vld [vmem:[%s913_s1 + $0x20] sm:$0xff]  ;;  %v71_v18 = vld [vmem:[%s912_s3 + $0x30] sm:$0xff] }
   0x5   :  { %v38_v15 = vld [vmem:[%s913_s1 + $0x28] sm:$0xff]  ;;  %600 = vmatprep.subr.bf16.mxu0 %v599_v7  ;;  %570 = vmatpush3.bf16.msra.mxu1 %v567_v3  ;;  %v575_v16 = vpack.c.bf16 %v70_v13, %v69_v11  ;;  %v72_v19 = vld [vmem:[%s912_s3 + $0x38] sm:$0xff]  ;;  %v39_v20 = vld [vmem:[%s913_s1 + $0x30] sm:$0xff] }
   0x6   :  { %602 = vmatpush3.bf16.msra.mxu0 %v599_v7  ;;  %572 = vmatprep.subr.bf16.mxu1 %v571_v8  ;;  %v607_v17 = vpack.c.bf16 %v38_v15, %v37_v14  ;;  %v40_v21 = vld [vmem:[%s913_s1 + $0x38] sm:$0xff]  ;;  %v579_v22 = vpack.c.bf16 %v72_v19, %v71_v18  ;;  %v73_v24 = vld [vmem:[%s912_s3 + $0x40] sm:$0xff]  ;;  %v74_v25 = vld [vmem:[%s912_s3 + $0x48] sm:$0xff] }
   0x7   :  { %604 = vmatprep.subr.bf16.mxu0 %v603_v12  ;;  %v611_v23 = vpack.c.bf16 %v40_v21, %v39_v20  ;;  %v49_v26 = vld [vmem:[%s914_s2] sm:$0xff]  ;;  %v42_v28 = vld [vmem:[%s913_s1 + $0x48] sm:$0xff]  ;;  %v583_v30 = vpack.c.bf16 %v74_v25, %v73_v24  ;;  %v75_v32 = vld [vmem:[%s912_s3 + $0x50] sm:$0xff] }
   0x8   :  { %v41_v27 = vld [vmem:[%s913_s1 + $0x40] sm:$0xff]  ;;  %487 = vmatprep.mubr.f32.mxu1 %v49_v26  ;;  %v76_v33 = vld [vmem:[%s912_s3 + $0x58] sm:$0xff]  ;;  %v43_v34 = vld [vmem:[%s913_s1 + $0x50] sm:$0xff] }
   0x9   :  { %574 = vmatpush3.bf16.msra.mxu1 %v571_v8  ;;  %v17_v29 = vld [vmem:[%s915_s0] sm:$0xff]  ;;  %v615_v31 = vpack.c.bf16 %v42_v28, %v41_v27  ;;  %v44_v35 = vld [vmem:[%s913_s1 + $0x58] sm:$0xff]  ;;  %v587_v36 = vpack.c.bf16 %v76_v33, %v75_v32  ;;  %v78_v39 = vld [vmem:[%s912_s3 + $0x68] sm:$0xff] }
   0xa   :  { %606 = vmatpush3.bf16.msra.mxu0 %v603_v12  ;;  %576 = vmatprep.subr.bf16.mxu1 %v575_v16  ;;  %v619_v37 = vpack.c.bf16 %v44_v35, %v43_v34  ;;  %v77_v38 = vld [vmem:[%s912_s3 + $0x60] sm:$0xff]  ;;  %v46_v41 = vld [vmem:[%s913_s1 + $0x68] sm:$0xff]  ;;  %v79_v44 = vld [vmem:[%s912_s3 + $0x70] sm:$0xff] }
   0xb   :  { %608 = vmatprep.subr.bf16.mxu0 %v607_v17  ;;  %543 = vmatprep.mubr.f32.mxu0 %v17_v29  ;;  %v45_v40 = vld [vmem:[%s913_s1 + $0x60] sm:$0xff]  ;;  %v591_v42 = vpack.c.bf16 %v78_v39, %v77_v38  ;;  %v80_v45 = vld [vmem:[%s912_s3 + $0x78] sm:$0xff]  ;;  %v47_v46 = vld [vmem:[%s913_s1 + $0x70] sm:$0xff] }
   0xc   :  { %v623_v43 = vpack.c.bf16 %v46_v41, %v45_v40  ;;  %v48_v47 = vld [vmem:[%s913_s1 + $0x78] sm:$0xff]  ;;  %v595_v48 = vpack.c.bf16 %v80_v45, %v79_v44  ;;  %v50_v50 = vld [vmem:[%s914_s2 + $0x8] sm:$0xff]  ;;  %v51_v52 = vld [vmem:[%s914_s2 + $0x10] sm:$0xff] }
   0xd   :  { %578 = vmatpush3.bf16.msra.mxu1 %v575_v16  ;;  %v627_v49 = vpack.c.bf16 %v48_v47, %v47_v46  ;;  %v18_v51 = vld [vmem:[%s915_s0 + $0x8] sm:$0xff]  ;;  %v19_v53 = vld [vmem:[%s915_s0 + $0x10] sm:$0xff]  ;;  %v52_v54 = vld [vmem:[%s914_s2 + $0x18] sm:$0xff] }
   0xe   :  { %610 = vmatpush3.bf16.msra.mxu0 %v607_v17  ;;  %580 = vmatprep.subr.bf16.mxu1 %v579_v22  ;;  %v20_v55 = vld [vmem:[%s915_s0 + $0x18] sm:$0xff]  ;;  %v53_v56 = vld [vmem:[%s914_s2 + $0x20] sm:$0xff]  ;;  %v54_v58 = vld [vmem:[%s914_s2 + $0x28] sm:$0xff] }
   0xf   :  { %612 = vmatprep.subr.bf16.mxu0 %v611_v23  ;;  %v21_v57 = vld [vmem:[%s915_s0 + $0x20] sm:$0xff]  ;;  %v22_v59 = vld [vmem:[%s915_s0 + $0x28] sm:$0xff]  ;;  %v55_v60 = vld [vmem:[%s914_s2 + $0x30] sm:$0xff] }
  0x10   :  { %v23_v61 = vld [vmem:[%s915_s0 + $0x30] sm:$0xff]  ;;  %v56_v62 = vld [vmem:[%s914_s2 + $0x38] sm:$0xff]  ;;  %v57_v0 = vld [vmem:[%s914_s2 + $0x40] sm:$0xff] }
  0x11   :  { %582 = vmatpush3.bf16.msra.mxu1 %v579_v22  ;;  %v24_v63 = vld [vmem:[%s915_s0 + $0x38] sm:$0xff]  ;;  %v25_v1 = vld [vmem:[%s915_s0 + $0x40] sm:$0xff]  ;;  %v58_v2 = vld [vmem:[%s914_s2 + $0x48] sm:$0xff] }
  0x12   :  { %614 = vmatpush3.bf16.msra.mxu0 %v611_v23  ;;  %584 = vmatprep.subr.bf16.mxu1 %v583_v30  ;;  %v26_v3 = vld [vmem:[%s915_s0 + $0x48] sm:$0xff]  ;;  %v59_v4 = vld [vmem:[%s914_s2 + $0x50] sm:$0xff]  ;;  %v60_v6 = vld [vmem:[%s914_s2 + $0x58] sm:$0xff] }
  0x13   :  { %616 = vmatprep.subr.bf16.mxu0 %v615_v31  ;;  %v27_v5 = vld [vmem:[%s915_s0 + $0x50] sm:$0xff]  ;;  %v28_v7 = vld [vmem:[%s915_s0 + $0x58] sm:$0xff]  ;;  %v61_v8 = vld [vmem:[%s914_s2 + $0x60] sm:$0xff] }
  0x14   :  { %v29_v9 = vld [vmem:[%s915_s0 + $0x60] sm:$0xff]  ;;  %v62_v10 = vld [vmem:[%s914_s2 + $0x68] sm:$0xff]  ;;  %v63_v12 = vld [vmem:[%s914_s2 + $0x70] sm:$0xff] }
  0x15   :  { %586 = vmatpush3.bf16.msra.mxu1 %v583_v30  ;;  %v30_v11 = vld [vmem:[%s915_s0 + $0x68] sm:$0xff]  ;;  %v31_v13 = vld [vmem:[%s915_s0 + $0x70] sm:$0xff]  ;;  %v64_v14 = vld [vmem:[%s914_s2 + $0x78] sm:$0xff] }
  0x16   :  { %618 = vmatpush3.bf16.msra.mxu0 %v615_v31  ;;  %588 = vmatprep.subr.bf16.mxu1 %v587_v36  ;;  %v32_v15 = vld [vmem:[%s915_s0 + $0x78] sm:$0xff] }
  0x17   :  { %620 = vmatprep.subr.bf16.mxu0 %v619_v37 }
  0x19   :  { %590 = vmatpush3.bf16.msra.mxu1 %v587_v36 }
  0x1a   :  { %622 = vmatpush3.bf16.msra.mxu0 %v619_v37  ;;  %592 = vmatprep.subr.bf16.mxu1 %v591_v42 }
  0x1b   :  { %624 = vmatprep.subr.bf16.mxu0 %v623_v43 }
  0x1d   :  { %594 = vmatpush3.bf16.msra.mxu1 %v591_v42 }
  0x1e   :  { %626 = vmatpush3.bf16.msra.mxu0 %v623_v43  ;;  %596 = vmatprep.subr.bf16.mxu1 %v595_v48 }
  0x1f   :  { %628 = vmatprep.subr.bf16.mxu0 %v627_v49 }
  0x21   :  { %598 = vmatpush3.bf16.msra.mxu1 %v595_v48 }
  0x22   :  { %630 = vmatpush3.bf16.msra.mxu0 %v627_v49 }
  0x24   :  { %488 = vmatmul.mubr.f32.vlgmr.msra.gmra.mrb[0].mxu1 %v50_v50 }
  0x25   :  { %544 = vmatmul.mubr.f32.vlgmr.msra.gmra.mrb[0].mxu0 %v18_v51  ;;  %490 = vmatprep.mubr.f32.mxu1 %v51_v52 }
  0x26   :  { %546 = vmatprep.mubr.f32.mxu0 %v19_v53 }
  0x28   :  { %491 = vmatmul.mubr.f32.gmra.mrb[2].mxu1 %v52_v54 }
  0x29   :  { %547 = vmatmul.mubr.f32.gmra.mrb[2].mxu0 %v20_v55  ;;  %493 = vmatprep.mubr.f32.mxu1 %v53_v56 }
  0x2a   :  { %549 = vmatprep.mubr.f32.mxu0 %v21_v57 }
  0x2c   :  { %494 = vmatmul.mubr.f32.gmra.mrb[4].mxu1 %v54_v58 }
  0x2d   :  { %550 = vmatmul.mubr.f32.gmra.mrb[4].mxu0 %v22_v59  ;;  %496 = vmatprep.mubr.f32.mxu1 %v55_v60 }
  0x2e   :  { %552 = vmatprep.mubr.f32.mxu0 %v23_v61 }
  0x30   :  { %497 = vmatmul.mubr.f32.gmra.mrb[6].mxu1 %v56_v62 }
  0x31   :  { %553 = vmatmul.mubr.f32.gmra.mrb[6].mxu0 %v24_v63  ;;  %499 = vmatprep.mubr.f32.mxu1 %v57_v0 }
  0x32   :  { %555 = vmatprep.mubr.f32.mxu0 %v25_v1 }
  0x34   :  { %500 = vmatmul.mubr.f32.gmra.mrb[8].mxu1 %v58_v2 }
  0x35   :  { %556 = vmatmul.mubr.f32.gmra.mrb[8].mxu0 %v26_v3  ;;  %502 = vmatprep.mubr.f32.mxu1 %v59_v4 }
  0x36   :  { %558 = vmatprep.mubr.f32.mxu0 %v27_v5 }
  0x38   :  { %503 = vmatmul.mubr.f32.gmra.mrb[10].mxu1 %v60_v6 }
  0x39   :  { %559 = vmatmul.mubr.f32.gmra.mrb[10].mxu0 %v28_v7  ;;  %505 = vmatprep.mubr.f32.mxu1 %v61_v8 }
  0x3a   :  { %561 = vmatprep.mubr.f32.mxu0 %v29_v9 }
  0x3c   :  { %506 = vmatmul.mubr.f32.gmra.mrb[12].mxu1 %v62_v10 }
  0x3d   :  { %562 = vmatmul.mubr.f32.gmra.mrb[12].mxu0 %v30_v11  ;;  %508 = vmatprep.mubr.f32.mxu1 %v63_v12 }
  0x3e   :  { %564 = vmatprep.mubr.f32.mxu0 %v31_v13 }
  0x40   :  { %509 = vmatmul.mubr.f32.gmra.mrb[14].mxu1 %v64_v14 }
  0x41   :  { %565 = vmatmul.mubr.f32.gmra.mrb[14].mxu0 %v32_v15 }
  0xf7   :  { %v489_v16 = vpop.f32.mrb[0].mxu1 }
  0xf8   :  { %v545_v17 = vpop.f32.mrb[0].mxu0  ;;  %v147_v18 = vpop.f32.mrb[1].mxu1 }
  0xf9   :  { %v298_v19 = vadd.f32 %v545_v17, %v489_v16  ;;  %v292_v20 = vpop.f32.mrb[1].mxu0 }
  0xfa   :  { %v293_v21 = vadd.f32 %v292_v20, %v147_v18 }
  0xfb   :  { %372 = vst [vmem:[%s916_s4 + $0x8] sm:$0xff] %v298_v19  ;;  %v492_v22 = vpop.f32.mrb[2].mxu1 }
  0xfc   :  { %371 = vst [vmem:[%s916_s4] sm:$0xff] %v293_v21  ;;  %v548_v23 = vpop.f32.mrb[2].mxu0  ;;  %v157_v24 = vpop.f32.mrb[3].mxu1 }
  0xfd   :  { %v308_v25 = vadd.f32 %v548_v23, %v492_v22  ;;  %v302_v26 = vpop.f32.mrb[3].mxu0 }
  0xfe   :  { %v303_v27 = vadd.f32 %v302_v26, %v157_v24 }
  0xff   :  { %374 = vst [vmem:[%s916_s4 + $0x18] sm:$0xff] %v308_v25  ;;  %v495_v28 = vpop.f32.mrb[4].mxu1 }
 0x100   :  { %373 = vst [vmem:[%s916_s4 + $0x10] sm:$0xff] %v303_v27  ;;  %v551_v29 = vpop.f32.mrb[4].mxu0  ;;  %v167_v30 = vpop.f32.mrb[5].mxu1 }
 0x101   :  { %v318_v31 = vadd.f32 %v551_v29, %v495_v28  ;;  %v312_v32 = vpop.f32.mrb[5].mxu0 }
 0x102   :  { %v313_v33 = vadd.f32 %v312_v32, %v167_v30 }
 0x103   :  { %376 = vst [vmem:[%s916_s4 + $0x28] sm:$0xff] %v318_v31  ;;  %v498_v34 = vpop.f32.mrb[6].mxu1 }
 0x104   :  { %375 = vst [vmem:[%s916_s4 + $0x20] sm:$0xff] %v313_v33  ;;  %v554_v35 = vpop.f32.mrb[6].mxu0  ;;  %v177_v36 = vpop.f32.mrb[7].mxu1 }
 0x105   :  { %v328_v37 = vadd.f32 %v554_v35, %v498_v34  ;;  %v322_v38 = vpop.f32.mrb[7].mxu0 }
 0x106   :  { %v323_v39 = vadd.f32 %v322_v38, %v177_v36 }
 0x107   :  { %378 = vst [vmem:[%s916_s4 + $0x38] sm:$0xff] %v328_v37  ;;  %v501_v40 = vpop.f32.mrb[8].mxu1 }
 0x108   :  { %377 = vst [vmem:[%s916_s4 + $0x30] sm:$0xff] %v323_v39  ;;  %v557_v41 = vpop.f32.mrb[8].mxu0  ;;  %v187_v42 = vpop.f32.mrb[9].mxu1 }
 0x109   :  { %v338_v43 = vadd.f32 %v557_v41, %v501_v40  ;;  %v332_v44 = vpop.f32.mrb[9].mxu0 }
 0x10a   :  { %v333_v45 = vadd.f32 %v332_v44, %v187_v42 }
 0x10b   :  { %380 = vst [vmem:[%s916_s4 + $0x48] sm:$0xff] %v338_v43  ;;  %v504_v46 = vpop.f32.mrb[10].mxu1 }
 0x10c   :  { %379 = vst [vmem:[%s916_s4 + $0x40] sm:$0xff] %v333_v45  ;;  %v560_v47 = vpop.f32.mrb[10].mxu0  ;;  %v197_v48 = vpop.f32.mrb[11].mxu1 }
 0x10d   :  { %v348_v49 = vadd.f32 %v560_v47, %v504_v46  ;;  %v342_v50 = vpop.f32.mrb[11].mxu0 }
 0x10e   :  { %v343_v51 = vadd.f32 %v342_v50, %v197_v48 }
 0x10f   :  { %382 = vst [vmem:[%s916_s4 + $0x58] sm:$0xff] %v348_v49  ;;  %v507_v52 = vpop.f32.mrb[12].mxu1 }
 0x110   :  { %381 = vst [vmem:[%s916_s4 + $0x50] sm:$0xff] %v343_v51  ;;  %v563_v53 = vpop.f32.mrb[12].mxu0  ;;  %v207_v54 = vpop.f32.mrb[13].mxu1 }
 0x111   :  { %v358_v55 = vadd.f32 %v563_v53, %v507_v52  ;;  %v352_v56 = vpop.f32.mrb[13].mxu0 }
 0x112   :  { %v353_v57 = vadd.f32 %v352_v56, %v207_v54 }
 0x113   :  { %384 = vst [vmem:[%s916_s4 + $0x68] sm:$0xff] %v358_v55  ;;  %v510_v58 = vpop.f32.mrb[14].mxu1 }
 0x114   :  { %383 = vst [vmem:[%s916_s4 + $0x60] sm:$0xff] %v353_v57  ;;  %v566_v59 = vpop.f32.mrb[14].mxu0  ;;  %v217_v60 = vpop.f32.mrb[15].mxu1 }
 0x115   :  { %v368_v61 = vadd.f32 %v566_v59, %v510_v58  ;;  %v362_v62 = vpop.f32.mrb[15].mxu0 }
 0x116   :  { %v363_v63 = vadd.f32 %v362_v62, %v217_v60 }
 0x117   :  { %386 = vst [vmem:[%s916_s4 + $0x78] sm:$0xff] %v368_v61 }
 0x118   :  { %385 = vst [vmem:[%s916_s4 + $0x70] sm:$0xff] %v363_v63 }

</bundles_post_ra>
